<compile_context>
chip_gen: v7x
topology: tpu7x:2x2x1
jax: 0.10.0
libtpu: 0.0.40
codegen_flags: <defaults>
</compile_context>

<pallas_src>
import functools

import jax
import jax.numpy as jnp
from jax.experimental import pallas as pl
from jax.experimental.pallas import tpu as pltpu

FEAT_C = 8        # backbone conv output channels
HID = 32          # neck hidden dim
OUT = 16          # embedding dim
TEMP = 0.1        # ContrastiveHead temperature
BASE_MOMENTUM = 0.99

LANES = 128
SUBLANES = 8

LANE_W = 512      # lanes per row of the flat EMA buffer (lane-dense blocks)
BM_MAX = 1024     # rows per EMA grid step -> 2 MiB blocks (fits default VMEM)


# ---------------------------------------------------------------------------
# Kernel A: 3x3 conv (stride 1, pad 1) + bias + ReLU + global average pool.
#   grid = (n2 // imgs,), "parallel" over image groups.
# ---------------------------------------------------------------------------
def _conv_pool_kernel(x_ref, wc_ref, bc_ref, pool_ref, pooled_ref,
                      xbuf_ref, rhs_ref, *, H, W, w2, shift_pad, num_pos,
                      imgs, cpad):
    # ---- build the zero-padded, flattened bf16 image buffer in VMEM --------
    # (conv spatial padding + flat shift padding + zero pad-channels; the
    #  padded copy never exists in HBM).
    xbuf_ref[...] = jnp.zeros_like(xbuf_ref)
    xv = x_ref[...]                                       # (imgs, C, H*W) bf16
    C = xv.shape[1]
    for r in range(H):
        dst = shift_pad + (r + 1) * w2 + 1
        xbuf_ref[:, 0:C, dst:dst + W] = xv[:, :, r * W:(r + 1) * W]

    # ---- im2col in VMEM: 9 statically shifted tap views of every image -----
    # rhs layout: K = 9*cpad rows (tap-major, channel-minor, sublane-aligned
    # 8-row blocks), positions of all images concatenated lane-dense.
    for i in range(imgs):
        xi = xbuf_ref[i]                                  # (cpad, flat_len)
        base = i * num_pos
        t = 0
        for dy in (-1, 0, 1):
            for dx in (-1, 0, 1):
                s = shift_pad + dy * w2 + dx
                rhs_ref[t * cpad:(t + 1) * cpad,
                        base:base + num_pos] = xi[:, s:s + num_pos]
                t += 1

    # ---- one K = 9*cpad GEMM for the whole image group (bf16 MXU, f32 acc) -
    conv = jnp.dot(wc_ref[...], rhs_ref[...],
                   preferred_element_type=jnp.float32)    # (F, imgs*num_pos)
    act = jnp.maximum(conv + bc_ref[...], 0.0)            # bias + ReLU (f32)

    # ---- fused global average pooling as a second matmul --------------------
    # pool_ref is block-diagonal (imgs*num_pos, imgs): interior mask (real
    # HxW conv outputs only; padded border positions are garbage and zeroed
    # here) scaled by 1/(H*W).
    pooled_t = jnp.dot(act, pool_ref[...],
                       preferred_element_type=jnp.float32)  # (F, imgs)
    pooled_ref[...] = pooled_t.T                          # (imgs, F)


# ---------------------------------------------------------------------------
# Kernel B: neck MLP + l2norm + similarity + NT-Xent loss (single step).
# ---------------------------------------------------------------------------
def _tail_kernel(pooled_ref, w1_ref, b1_ref, w2_ref, b2_ref, loss_ref, *,
                 temperature):
    pooled = pooled_ref[...]                              # (2N, F) f32
    h = jnp.maximum(
        jnp.dot(pooled, w1_ref[...], preferred_element_type=jnp.float32)
        + b1_ref[...], 0.0)                               # (2N, HID_P) lane-dense
    z = (jnp.dot(h, w2_ref[...], preferred_element_type=jnp.float32)
         + b2_ref[...])                                   # (2N, OUT_P), zero-padded cols
    norm = jnp.sqrt(jnp.sum(z * z, axis=1, keepdims=True))
    zn = z / (norm + 1e-10)                               # matches F-reference

    # s = zn @ zn.T (contract the feature dim)
    s = jax.lax.dot_general(zn, zn, (((1,), (1,)), ((), ())),
                            preferred_element_type=jnp.float32)  # (2N, 2N)
    t2 = s.shape[0]
    row = jax.lax.broadcasted_iota(jnp.int32, (t2, t2), 0)
    col = jax.lax.broadcasted_iota(jnp.int32, (t2, t2), 1)
    # rows 2k and 2k+1 are the two views of image k -> integer pair ids
    same_pair = (row // 2) == (col // 2)
    is_pos = jnp.logical_and(same_pair, row != col)
    is_neg = jnp.logical_not(same_pair)

    logits = s * (1.0 / temperature)
    pos = jnp.sum(jnp.where(is_pos, logits, 0.0), axis=1, keepdims=True)
    mx = jnp.maximum(
        jnp.max(jnp.where(is_neg, logits, -1e30), axis=1, keepdims=True), pos)
    denom = jnp.exp(pos - mx) + jnp.sum(
        jnp.where(is_neg, jnp.exp(logits - mx), 0.0), axis=1, keepdims=True)
    per_row = jnp.log(denom) + mx - pos                   # CE with label 0
    loss_ref[...] = jnp.mean(per_row, keepdims=True)


def simclr_forward_train(params, img):
    """img: (N, 2, C, H, W) two-view batch; returns {'loss': scalar}."""
    N, V, C, H, W = img.shape
    assert V == 2
    n2 = N * V
    h2, w2 = H + 2, W + 2
    num_pos = h2 * w2                 # conv evaluated on the padded grid
    shift_pad = w2 + 1                # max |tap shift| along the flat axis
    flat_len = num_pos + 2 * shift_pad
    cpad = -(-C // SUBLANES) * SUBLANES   # channels padded to sublane blocks

    # images per grid step: amortize per-step pipeline overhead and widen the
    # conv GEMM's lane-dense N dim; chosen so the pooled output block is legal
    # under the (8,128) rule (imgs % 8 == 0 or imgs == n2).
    if n2 % 16 == 0:
        imgs = 16
    elif n2 % 8 == 0:
        imgs = 8
    else:
        imgs = n2
    n_groups = n2 // imgs

    # bf16 once in the wrapper -> half the HBM->VMEM image DMA.
    x = img.reshape(n2, C, H * W).astype(jnp.bfloat16)

    # conv weights -> (F, 9*cpad): tap-major, channel-minor, zero pad-channels
    wct = jnp.transpose(params["conv_w"], (0, 2, 3, 1))           # (F,3,3,C)
    wct = jnp.pad(wct, ((0, 0), (0, 0), (0, 0), (0, cpad - C)))
    wct = wct.reshape(FEAT_C, 9 * cpad).astype(jnp.bfloat16)
    bc = params["conv_b"].reshape(FEAT_C, 1).astype(jnp.float32)

    # block-diagonal pooling matrix: interior mask (real HxW outputs) / (H*W)
    hp = jnp.arange(h2)[:, None]
    wp = jnp.arange(w2)[None, :]
    interior = ((hp >= 1) & (hp <= H) & (wp >= 1) & (wp <= W)).astype(jnp.float32)
    pool_col = interior.reshape(num_pos, 1) / float(H * W)
    pool_mat = jnp.kron(jnp.eye(imgs, dtype=jnp.float32), pool_col)  # (imgs*P, imgs)

    conv_kernel = functools.partial(
        _conv_pool_kernel, H=H, W=W, w2=w2, shift_pad=shift_pad,
        num_pos=num_pos, imgs=imgs, cpad=cpad)

    pooled = pl.pallas_call(
        conv_kernel,
        out_shape=jax.ShapeDtypeStruct((n2, FEAT_C), jnp.float32),
        grid=(n_groups,),
        in_specs=[
            pl.BlockSpec((imgs, C, H * W), lambda g: (g, 0, 0)),      # images
            pl.BlockSpec((FEAT_C, 9 * cpad), lambda g: (0, 0)),       # conv w
            pl.BlockSpec((FEAT_C, 1), lambda g: (0, 0)),              # conv b
            pl.BlockSpec((imgs * num_pos, imgs), lambda g: (0, 0)),   # pool mat
        ],
        out_specs=pl.BlockSpec((imgs, FEAT_C), lambda g: (g, 0)),
        scratch_shapes=[
            pltpu.VMEM((imgs, cpad, flat_len), jnp.bfloat16),         # padded imgs
            pltpu.VMEM((9 * cpad, imgs * num_pos), jnp.bfloat16),     # im2col RHS
        ],
        compiler_params=pltpu.CompilerParams(
            dimension_semantics=("parallel",)),
    )(x, wct, bc, pool_mat)

    # neck weights zero-padded to lane-dense 128-wide columns (free zeros)
    hid_p = -(-HID // LANES) * LANES
    out_p = -(-OUT // LANES) * LANES
    w1p = jnp.zeros((FEAT_C, hid_p), jnp.float32).at[:, :HID].set(params["fc1_w"].T)
    b1p = jnp.zeros((1, hid_p), jnp.float32).at[:, :HID].set(params["fc1_b"][None, :])
    w2p = jnp.zeros((hid_p, out_p), jnp.float32).at[:HID, :OUT].set(params["fc2_w"].T)
    b2p = jnp.zeros((1, out_p), jnp.float32).at[:, :OUT].set(params["fc2_b"][None, :])

    # explicit scoped-VMEM budget sized from the (2N,2N) logits + temporaries
    tail_vmem = int(min(64 * 1024 * 1024,
                        max(32 * 1024 * 1024, 12 * n2 * n2 * 4)))

    loss = pl.pallas_call(
        functools.partial(_tail_kernel, temperature=TEMP),
        out_shape=jax.ShapeDtypeStruct((1, 1), jnp.float32),
        grid=(1,),
        in_specs=[
            pl.BlockSpec((n2, FEAT_C), lambda i: (0, 0)),
            pl.BlockSpec((FEAT_C, hid_p), lambda i: (0, 0)),
            pl.BlockSpec((1, hid_p), lambda i: (0, 0)),
            pl.BlockSpec((hid_p, out_p), lambda i: (0, 0)),
            pl.BlockSpec((1, out_p), lambda i: (0, 0)),
        ],
        out_specs=pl.BlockSpec((1, 1), lambda i: (0, 0)),
        compiler_params=pltpu.CompilerParams(
            dimension_semantics=("arbitrary",),
            vmem_limit_bytes=tail_vmem),
    )(pooled, w1p, b1p, w2p, b2p)
    return {"loss": loss[0, 0]}


# ---------------------------------------------------------------------------
# EMA momentum update: target network state lives permanently in one flat,
# lane-dense (rows, 512) buffer; the update is a single aliased pallas_call.
# ---------------------------------------------------------------------------
def _momentum_kernel(tgt_ref, onl_ref, out_ref, *, momentum):
    out_ref[...] = tgt_ref[...] * momentum + onl_ref[...] * (1.0 - momentum)


def param_layout(params):
    keys = sorted(params.keys())
    entries, off = [], 0
    for k in keys:
        sz = int(params[k].size)
        entries.append((k, tuple(params[k].shape), off, sz))
        off += sz
    total = off
    rows = -(-total // LANE_W)
    if rows <= BM_MAX:
        rows_pad = -(-rows // SUBLANES) * SUBLANES
    else:
        rows_pad = -(-rows // BM_MAX) * BM_MAX
    return entries, total, rows_pad


def flatten_params(params, layout):
    entries, total, rows_pad = layout
    flat = jnp.concatenate([params[k].reshape(-1).astype(jnp.float32)
                            for k, _, _, _ in entries])
    flat = jnp.pad(flat, (0, rows_pad * LANE_W - total))
    return flat.reshape(rows_pad, LANE_W)


def unflatten_params(flat2d, layout):
    entries, _, _ = layout
    flat = flat2d.reshape(-1)
    return {k: flat[off:off + sz].reshape(shape)
            for k, shape, off, sz in entries}


def momentum_update_flat(flat_tgt, flat_onl, momentum=BASE_MOMENTUM):
    rows_pad = flat_tgt.shape[0]
    bm = rows_pad if rows_pad <= BM_MAX else BM_MAX
    return pl.pallas_call(
        functools.partial(_momentum_kernel, momentum=float(momentum)),
        out_shape=jax.ShapeDtypeStruct(flat_tgt.shape, flat_tgt.dtype),
        grid=(rows_pad // bm,),
        in_specs=[pl.BlockSpec((bm, LANE_W), lambda i: (i, 0)),
                  pl.BlockSpec((bm, LANE_W), lambda i: (i, 0))],
        out_specs=pl.BlockSpec((bm, LANE_W), lambda i: (i, 0)),
        input_output_aliases={0: 0},     # true in-place EMA on the flat buffer
        compiler_params=pltpu.CompilerParams(
            dimension_semantics=("parallel",)),
    )(flat_tgt, flat_onl)


# ------------------------------- params / glue ------------------------------
def init_params(key, c_in):
    ks = jax.random.split(key, 3)

    def kaiming(k, shape, fan_in):
        return jax.random.normal(k, shape, jnp.float32) * jnp.sqrt(2.0 / fan_in)

    return {
        "conv_w": kaiming(ks[0], (FEAT_C, c_in, 3, 3), c_in * 9),  # torch conv layout
        "conv_b": jnp.zeros((FEAT_C,), jnp.float32),
        "fc1_w": kaiming(ks[1], (HID, FEAT_C), FEAT_C),            # torch Linear layout
        "fc1_b": jnp.zeros((HID,), jnp.float32),
        "fc2_w": kaiming(ks[2], (OUT, HID), HID),
        "fc2_b": jnp.zeros((OUT,), jnp.float32),
    }


# Pure-JAX reference (same bf16 rounding of the conv GEMM operands) used only
# as an in-script correctness check.
def forward_train_reference(params, img):
    N, V, C, H, W = img.shape
    x = img.reshape(N * V, C, H, W)
    xb = x.astype(jnp.bfloat16).astype(jnp.float32)
    wb = params["conv_w"].astype(jnp.bfloat16).astype(jnp.float32)
    xp = jnp.pad(xb, ((0, 0), (0, 0), (1, 1), (1, 1)))
    out = jnp.zeros((N * V, FEAT_C, H, W), jnp.float32)
    for ky in range(3):
        for kx in range(3):
            patch = xp[:, :, ky:ky + H, kx:kx + W]
            out = out + jnp.einsum("nchw,oc->nohw", patch, wb[:, :, ky, kx])
    out = jax.nn.relu(out + params["conv_b"][None, :, None, None])
    pooled = out.mean(axis=(2, 3))
    h = jax.nn.relu(pooled @ params["fc1_w"].T + params["fc1_b"])
    z = h @ params["fc2_w"].T + params["fc2_b"]
    zn = z / (jnp.linalg.norm(z, axis=1, keepdims=True) + 1e-10)
    s = zn @ zn.T
    t2 = N * V
    row = jnp.arange(t2)
    partner = row + 1 - 2 * (row % 2)
    logits = s / TEMP
    pos = logits[row, partner]
    col = jnp.arange(t2)[None, :]
    is_neg = (col // 2) != (row[:, None] // 2)
    mx = jnp.maximum(jnp.max(jnp.where(is_neg, logits, -1e30), axis=1), pos)
    denom = jnp.exp(pos - mx) + jnp.sum(
        jnp.where(is_neg, jnp.exp(logits - mx[:, None]), 0.0), axis=1)
    return jnp.mean(jnp.log(denom) + mx - pos)


if __name__ == "__main__":
    key = jax.random.PRNGKey(0)
    kp, kx = jax.random.split(key)

    N, C, H, W = 2, 4, 16, 16
    params = init_params(kp, C)
    img = jax.random.normal(kx, (N, 2, C, H, W), jnp.float32)

    losses = simclr_forward_train(params, img)
    loss = jax.block_until_ready(losses["loss"])
    assert bool(jnp.isfinite(loss)), "loss is not finite"

    ref = float(jax.block_until_ready(forward_train_reference(params, img)))
    assert abs(float(loss) - ref) <= 1e-2 + 1e-2 * abs(ref), (float(loss), ref)

    # Momentum-network state kept permanently in the flat lane-dense layout.
    # TODO(synk): in a real training loop the online params would also be kept
    #             flat (or donated) so the per-update flatten pass disappears.
    layout = param_layout(params)
    momentum_flat = flatten_params(params, layout)   # init_momentum_weights: copy
    online_flat = flatten_params(params, layout)
    momentum_flat = momentum_update_flat(momentum_flat, online_flat, BASE_MOMENTUM)
    jax.block_until_ready(momentum_flat)
    momentum_params = unflatten_params(momentum_flat, layout)
    # momentum nets start as copies -> EMA of identical params is a no-op
    for k in params:
        assert bool(jnp.allclose(momentum_params[k], params[k],
                                 rtol=1e-4, atol=1e-5)), k

    print("KERNEL_OK")
</pallas_src>

<mosaic_0001>
module attributes {stable_mosaic.version = 11 : i64} {
  func.func @_conv_pool_kernel(%arg0: i32, %arg1: memref<4x4x256xbf16, #tpu.memory_space<vmem>>, %arg2: memref<8x72xbf16, #tpu.memory_space<vmem>>, %arg3: memref<8x1xf32, #tpu.memory_space<vmem>>, %arg4: memref<1296x4xf32, #tpu.memory_space<vmem>>, %arg5: memref<4x8xf32, #tpu.memory_space<vmem>>, %arg6: memref<4x8x362xbf16, #tpu.memory_space<vmem>>, %arg7: memref<72x1296xbf16, #tpu.memory_space<vmem>>) attributes {dimension_semantics = [#tpu.dimension_semantics<parallel>], iteration_bounds = array<i64: 1>, scalar_prefetch = 0 : i64, scratch_operands = 2 : i64, tpu.core_type = #tpu.core_type<tc>, window_params = [{transform_indices = @transform_0, window_bounds = array<i64: 4, 4, 256>}, {pipeline_mode = #tpu.pipeline_mode<synchronous>, transform_indices = @transform_1, window_bounds = array<i64: 8, 72>}, {pipeline_mode = #tpu.pipeline_mode<synchronous>, transform_indices = @transform_2, window_bounds = array<i64: 8, 1>}, {pipeline_mode = #tpu.pipeline_mode<synchronous>, transform_indices = @transform_3, window_bounds = array<i64: 1296, 4>}, {transform_indices = @transform_4, window_bounds = array<i64: 4, 8>}]} {
    %cst = arith.constant 0.000000e+00 : bf16
    %0 = vector.broadcast %cst : bf16 to vector<4x8x362xbf16>
    %c0 = arith.constant 0 : index
    %c0_0 = arith.constant 0 : index
    %c0_1 = arith.constant 0 : index
    %1 = vector.load %arg6[%c0, %c0_0, %c0_1] : memref<4x8x362xbf16, #tpu.memory_space<vmem>>, vector<4x8x362xbf16>
    tpu.vector_store %arg6[%c0, %c0_0, %c0_1], %0 {strides = array<i32>} : memref<4x8x362xbf16, #tpu.memory_space<vmem>>, vector<4x8x362xbf16>,
    %c0_2 = arith.constant 0 : index
    %c0_3 = arith.constant 0 : index
    %c0_4 = arith.constant 0 : index
    %2 = vector.load %arg1[%c0_2, %c0_3, %c0_4] : memref<4x4x256xbf16, #tpu.memory_space<vmem>>, vector<4x4x256xbf16>
    %3 = vector.extract_strided_slice %2 {offsets = [0, 0, 0], sizes = [4, 4, 16], strides = [1, 1, 1]} : vector<4x4x256xbf16> to vector<4x4x16xbf16>
    %c0_5 = arith.constant 0 : index
    %c0_6 = arith.constant 0 : index
    %c38 = arith.constant 38 : index
    %4 = vector.load %arg6[%c0_5, %c0_6, %c38] : memref<4x8x362xbf16, #tpu.memory_space<vmem>>, vector<4x4x16xbf16>
    tpu.vector_store %arg6[%c0_5, %c0_6, %c38], %3 {strides = array<i32>} : memref<4x8x362xbf16, #tpu.memory_space<vmem>>, vector<4x4x16xbf16>,
    %5 = vector.extract_strided_slice %2 {offsets = [0, 0, 16], sizes = [4, 4, 16], strides = [1, 1, 1]} : vector<4x4x256xbf16> to vector<4x4x16xbf16>
    %c0_7 = arith.constant 0 : index
    %c0_8 = arith.constant 0 : index
    %c56 = arith.constant 56 : index
    %6 = vector.load %arg6[%c0_7, %c0_8, %c56] : memref<4x8x362xbf16, #tpu.memory_space<vmem>>, vector<4x4x16xbf16>
    tpu.vector_store %arg6[%c0_7, %c0_8, %c56], %5 {strides = array<i32>} : memref<4x8x362xbf16, #tpu.memory_space<vmem>>, vector<4x4x16xbf16>,
    %7 = vector.extract_strided_slice %2 {offsets = [0, 0, 32], sizes = [4, 4, 16], strides = [1, 1, 1]} : vector<4x4x256xbf16> to vector<4x4x16xbf16>
    %c0_9 = arith.constant 0 : index
    %c0_10 = arith.constant 0 : index
    %c74 = arith.constant 74 : index
    %8 = vector.load %arg6[%c0_9, %c0_10, %c74] : memref<4x8x362xbf16, #tpu.memory_space<vmem>>, vector<4x4x16xbf16>
    tpu.vector_store %arg6[%c0_9, %c0_10, %c74], %7 {strides = array<i32>} : memref<4x8x362xbf16, #tpu.memory_space<vmem>>, vector<4x4x16xbf16>,
    %9 = vector.extract_strided_slice %2 {offsets = [0, 0, 48], sizes = [4, 4, 16], strides = [1, 1, 1]} : vector<4x4x256xbf16> to vector<4x4x16xbf16>
    %c0_11 = arith.constant 0 : index
    %c0_12 = arith.constant 0 : index
    %c92 = arith.constant 92 : index
    %10 = vector.load %arg6[%c0_11, %c0_12, %c92] : memref<4x8x362xbf16, #tpu.memory_space<vmem>>, vector<4x4x16xbf16>
    tpu.vector_store %arg6[%c0_11, %c0_12, %c92], %9 {strides = array<i32>} : memref<4x8x362xbf16, #tpu.memory_space<vmem>>, vector<4x4x16xbf16>,
    %11 = vector.extract_strided_slice %2 {offsets = [0, 0, 64], sizes = [4, 4, 16], strides = [1, 1, 1]} : vector<4x4x256xbf16> to vector<4x4x16xbf16>
    %c0_13 = arith.constant 0 : index
    %c0_14 = arith.constant 0 : index
    %c110 = arith.constant 110 : index
    %12 = vector.load %arg6[%c0_13, %c0_14, %c110] : memref<4x8x362xbf16, #tpu.memory_space<vmem>>, vector<4x4x16xbf16>
    tpu.vector_store %arg6[%c0_13, %c0_14, %c110], %11 {strides = array<i32>} : memref<4x8x362xbf16, #tpu.memory_space<vmem>>, vector<4x4x16xbf16>,
    %13 = vector.extract_strided_slice %2 {offsets = [0, 0, 80], sizes = [4, 4, 16], strides = [1, 1, 1]} : vector<4x4x256xbf16> to vector<4x4x16xbf16>
    %c0_15 = arith.constant 0 : index
    %c0_16 = arith.constant 0 : index
    %c128 = arith.constant 128 : index
    %14 = vector.load %arg6[%c0_15, %c0_16, %c128] : memref<4x8x362xbf16, #tpu.memory_space<vmem>>, vector<4x4x16xbf16>
    tpu.vector_store %arg6[%c0_15, %c0_16, %c128], %13 {strides = array<i32>} : memref<4x8x362xbf16, #tpu.memory_space<vmem>>, vector<4x4x16xbf16>,
    %15 = vector.extract_strided_slice %2 {offsets = [0, 0, 96], sizes = [4, 4, 16], strides = [1, 1, 1]} : vector<4x4x256xbf16> to vector<4x4x16xbf16>
    %c0_17 = arith.constant 0 : index
    %c0_18 = arith.constant 0 : index
    %c146 = arith.constant 146 : index
    %16 = vector.load %arg6[%c0_17, %c0_18, %c146] : memref<4x8x362xbf16, #tpu.memory_space<vmem>>, vector<4x4x16xbf16>
    tpu.vector_store %arg6[%c0_17, %c0_18, %c146], %15 {strides = array<i32>} : memref<4x8x362xbf16, #tpu.memory_space<vmem>>, vector<4x4x16xbf16>,
    %17 = vector.extract_strided_slice %2 {offsets = [0, 0, 112], sizes = [4, 4, 16], strides = [1, 1, 1]} : vector<4x4x256xbf16> to vector<4x4x16xbf16>
    %c0_19 = arith.constant 0 : index
    %c0_20 = arith.constant 0 : index
    %c164 = arith.constant 164 : index
    %18 = vector.load %arg6[%c0_19, %c0_20, %c164] : memref<4x8x362xbf16, #tpu.memory_space<vmem>>, vector<4x4x16xbf16>
    tpu.vector_store %arg6[%c0_19, %c0_20, %c164], %17 {strides = array<i32>} : memref<4x8x362xbf16, #tpu.memory_space<vmem>>, vector<4x4x16xbf16>,
    %19 = vector.extract_strided_slice %2 {offsets = [0, 0, 128], sizes = [4, 4, 16], strides = [1, 1, 1]} : vector<4x4x256xbf16> to vector<4x4x16xbf16>
    %c0_21 = arith.constant 0 : index
    %c0_22 = arith.constant 0 : index
    %c182 = arith.constant 182 : index
    %20 = vector.load %arg6[%c0_21, %c0_22, %c182] : memref<4x8x362xbf16, #tpu.memory_space<vmem>>, vector<4x4x16xbf16>
    tpu.vector_store %arg6[%c0_21, %c0_22, %c182], %19 {strides = array<i32>} : memref<4x8x362xbf16, #tpu.memory_space<vmem>>, vector<4x4x16xbf16>,
    %21 = vector.extract_strided_slice %2 {offsets = [0, 0, 144], sizes = [4, 4, 16], strides = [1, 1, 1]} : vector<4x4x256xbf16> to vector<4x4x16xbf16>
    %c0_23 = arith.constant 0 : index
    %c0_24 = arith.constant 0 : index
    %c200 = arith.constant 200 : index
    %22 = vector.load %arg6[%c0_23, %c0_24, %c200] : memref<4x8x362xbf16, #tpu.memory_space<vmem>>, vector<4x4x16xbf16>
    tpu.vector_store %arg6[%c0_23, %c0_24, %c200], %21 {strides = array<i32>} : memref<4x8x362xbf16, #tpu.memory_space<vmem>>, vector<4x4x16xbf16>,
    %23 = vector.extract_strided_slice %2 {offsets = [0, 0, 160], sizes = [4, 4, 16], strides = [1, 1, 1]} : vector<4x4x256xbf16> to vector<4x4x16xbf16>
    %c0_25 = arith.constant 0 : index
    %c0_26 = arith.constant 0 : index
    %c218 = arith.constant 218 : index
    %24 = vector.load %arg6[%c0_25, %c0_26, %c218] : memref<4x8x362xbf16, #tpu.memory_space<vmem>>, vector<4x4x16xbf16>
    tpu.vector_store %arg6[%c0_25, %c0_26, %c218], %23 {strides = array<i32>} : memref<4x8x362xbf16, #tpu.memory_space<vmem>>, vector<4x4x16xbf16>,
    %25 = vector.extract_strided_slice %2 {offsets = [0, 0, 176], sizes = [4, 4, 16], strides = [1, 1, 1]} : vector<4x4x256xbf16> to vector<4x4x16xbf16>
    %c0_27 = arith.constant 0 : index
    %c0_28 = arith.constant 0 : index
    %c236 = arith.constant 236 : index
    %26 = vector.load %arg6[%c0_27, %c0_28, %c236] : memref<4x8x362xbf16, #tpu.memory_space<vmem>>, vector<4x4x16xbf16>
    tpu.vector_store %arg6[%c0_27, %c0_28, %c236], %25 {strides = array<i32>} : memref<4x8x362xbf16, #tpu.memory_space<vmem>>, vector<4x4x16xbf16>,
    %27 = vector.extract_strided_slice %2 {offsets = [0, 0, 192], sizes = [4, 4, 16], strides = [1, 1, 1]} : vector<4x4x256xbf16> to vector<4x4x16xbf16>
    %c0_29 = arith.constant 0 : index
    %c0_30 = arith.constant 0 : index
    %c254 = arith.constant 254 : index
    %28 = vector.load %arg6[%c0_29, %c0_30, %c254] : memref<4x8x362xbf16, #tpu.memory_space<vmem>>, vector<4x4x16xbf16>
    tpu.vector_store %arg6[%c0_29, %c0_30, %c254], %27 {strides = array<i32>} : memref<4x8x362xbf16, #tpu.memory_space<vmem>>, vector<4x4x16xbf16>,
    %29 = vector.extract_strided_slice %2 {offsets = [0, 0, 208], sizes = [4, 4, 16], strides = [1, 1, 1]} : vector<4x4x256xbf16> to vector<4x4x16xbf16>
    %c0_31 = arith.constant 0 : index
    %c0_32 = arith.constant 0 : index
    %c272 = arith.constant 272 : index
    %30 = vector.load %arg6[%c0_31, %c0_32, %c272] : memref<4x8x362xbf16, #tpu.memory_space<vmem>>, vector<4x4x16xbf16>
    tpu.vector_store %arg6[%c0_31, %c0_32, %c272], %29 {strides = array<i32>} : memref<4x8x362xbf16, #tpu.memory_space<vmem>>, vector<4x4x16xbf16>,
    %31 = vector.extract_strided_slice %2 {offsets = [0, 0, 224], sizes = [4, 4, 16], strides = [1, 1, 1]} : vector<4x4x256xbf16> to vector<4x4x16xbf16>
    %c0_33 = arith.constant 0 : index
    %c0_34 = arith.constant 0 : index
    %c290 = arith.constant 290 : index
    %32 = vector.load %arg6[%c0_33, %c0_34, %c290] : memref<4x8x362xbf16, #tpu.memory_space<vmem>>, vector<4x4x16xbf16>
    tpu.vector_store %arg6[%c0_33, %c0_34, %c290], %31 {strides = array<i32>} : memref<4x8x362xbf16, #tpu.memory_space<vmem>>, vector<4x4x16xbf16>,
    %33 = vector.extract_strided_slice %2 {offsets = [0, 0, 240], sizes = [4, 4, 16], strides = [1, 1, 1]} : vector<4x4x256xbf16> to vector<4x4x16xbf16>
    %c0_35 = arith.constant 0 : index
    %c0_36 = arith.constant 0 : index
    %c308 = arith.constant 308 : index
    %34 = vector.load %arg6[%c0_35, %c0_36, %c308] : memref<4x8x362xbf16, #tpu.memory_space<vmem>>, vector<4x4x16xbf16>
    tpu.vector_store %arg6[%c0_35, %c0_36, %c308], %33 {strides = array<i32>} : memref<4x8x362xbf16, #tpu.memory_space<vmem>>, vector<4x4x16xbf16>,
    %c0_37 = arith.constant 0 : index
    %c0_38 = arith.constant 0 : index
    %c0_39 = arith.constant 0 : index
    %35 = vector.load %arg6[%c0_37, %c0_38, %c0_39] : memref<4x8x362xbf16, #tpu.memory_space<vmem>>, vector<1x8x362xbf16>
    %36 = vector.shape_cast %35 : vector<1x8x362xbf16> to vector<8x362xbf16>
    %37 = vector.extract_strided_slice %36 {offsets = [0, 0], sizes = [8, 324], strides = [1, 1]} : vector<8x362xbf16> to vector<8x324xbf16>
    %c0_40 = arith.constant 0 : index
    %c0_41 = arith.constant 0 : index
    %38 = vector.load %arg7[%c0_40, %c0_41] : memref<72x1296xbf16, #tpu.memory_space<vmem>>, vector<8x324xbf16>
    tpu.vector_store %arg7[%c0_40, %c0_41], %37 {strides = array<i32>} : memref<72x1296xbf16, #tpu.memory_space<vmem>>, vector<8x324xbf16>,
    %39 = vector.extract_strided_slice %36 {offsets = [0, 1], sizes = [8, 324], strides = [1, 1]} : vector<8x362xbf16> to vector<8x324xbf16>
    %c8 = arith.constant 8 : index
    %c0_42 = arith.constant 0 : index
    %40 = vector.load %arg7[%c8, %c0_42] : memref<72x1296xbf16, #tpu.memory_space<vmem>>, vector<8x324xbf16>
    tpu.vector_store %arg7[%c8, %c0_42], %39 {strides = array<i32>} : memref<72x1296xbf16, #tpu.memory_space<vmem>>, vector<8x324xbf16>,
    %41 = vector.extract_strided_slice %36 {offsets = [0, 2], sizes = [8, 324], strides = [1, 1]} : vector<8x362xbf16> to vector<8x324xbf16>
    %c16 = arith.constant 16 : index
    %c0_43 = arith.constant 0 : index
    %42 = vector.load %arg7[%c16, %c0_43] : memref<72x1296xbf16, #tpu.memory_space<vmem>>, vector<8x324xbf16>
    tpu.vector_store %arg7[%c16, %c0_43], %41 {strides = array<i32>} : memref<72x1296xbf16, #tpu.memory_space<vmem>>, vector<8x324xbf16>,
    %43 = vector.extract_strided_slice %36 {offsets = [0, 18], sizes = [8, 324], strides = [1, 1]} : vector<8x362xbf16> to vector<8x324xbf16>
    %c24 = arith.constant 24 : index
    %c0_44 = arith.constant 0 : index
    %44 = vector.load %arg7[%c24, %c0_44] : memref<72x1296xbf16, #tpu.memory_space<vmem>>, vector<8x324xbf16>
    tpu.vector_store %arg7[%c24, %c0_44], %43 {strides = array<i32>} : memref<72x1296xbf16, #tpu.memory_space<vmem>>, vector<8x324xbf16>,
    %45 = vector.extract_strided_slice %36 {offsets = [0, 19], sizes = [8, 324], strides = [1, 1]} : vector<8x362xbf16> to vector<8x324xbf16>
    %c32 = arith.constant 32 : index
    %c0_45 = arith.constant 0 : index
    %46 = vector.load %arg7[%c32, %c0_45] : memref<72x1296xbf16, #tpu.memory_space<vmem>>, vector<8x324xbf16>
    tpu.vector_store %arg7[%c32, %c0_45], %45 {strides = array<i32>} : memref<72x1296xbf16, #tpu.memory_space<vmem>>, vector<8x324xbf16>,
    %47 = vector.extract_strided_slice %36 {offsets = [0, 20], sizes = [8, 324], strides = [1, 1]} : vector<8x362xbf16> to vector<8x324xbf16>
    %c40 = arith.constant 40 : index
    %c0_46 = arith.constant 0 : index
    %48 = vector.load %arg7[%c40, %c0_46] : memref<72x1296xbf16, #tpu.memory_space<vmem>>, vector<8x324xbf16>
    tpu.vector_store %arg7[%c40, %c0_46], %47 {strides = array<i32>} : memref<72x1296xbf16, #tpu.memory_space<vmem>>, vector<8x324xbf16>,
    %49 = vector.extract_strided_slice %36 {offsets = [0, 36], sizes = [8, 324], strides = [1, 1]} : vector<8x362xbf16> to vector<8x324xbf16>
    %c48 = arith.constant 48 : index
    %c0_47 = arith.constant 0 : index
    %50 = vector.load %arg7[%c48, %c0_47] : memref<72x1296xbf16, #tpu.memory_space<vmem>>, vector<8x324xbf16>
    tpu.vector_store %arg7[%c48, %c0_47], %49 {strides = array<i32>} : memref<72x1296xbf16, #tpu.memory_space<vmem>>, vector<8x324xbf16>,
    %51 = vector.extract_strided_slice %36 {offsets = [0, 37], sizes = [8, 324], strides = [1, 1]} : vector<8x362xbf16> to vector<8x324xbf16>
    %c56_48 = arith.constant 56 : index
    %c0_49 = arith.constant 0 : index
    %52 = vector.load %arg7[%c56_48, %c0_49] : memref<72x1296xbf16, #tpu.memory_space<vmem>>, vector<8x324xbf16>
    tpu.vector_store %arg7[%c56_48, %c0_49], %51 {strides = array<i32>} : memref<72x1296xbf16, #tpu.memory_space<vmem>>, vector<8x324xbf16>,
    %53 = vector.extract_strided_slice %36 {offsets = [0, 38], sizes = [8, 324], strides = [1, 1]} : vector<8x362xbf16> to vector<8x324xbf16>
    %c64 = arith.constant 64 : index
    %c0_50 = arith.constant 0 : index
    %54 = vector.load %arg7[%c64, %c0_50] : memref<72x1296xbf16, #tpu.memory_space<vmem>>, vector<8x324xbf16>
    tpu.vector_store %arg7[%c64, %c0_50], %53 {strides = array<i32>} : memref<72x1296xbf16, #tpu.memory_space<vmem>>, vector<8x324xbf16>,
    %c1 = arith.constant 1 : index
    %c0_51 = arith.constant 0 : index
    %c0_52 = arith.constant 0 : index
    %55 = vector.load %arg6[%c1, %c0_51, %c0_52] : memref<4x8x362xbf16, #tpu.memory_space<vmem>>, vector<1x8x362xbf16>
    %56 = vector.shape_cast %55 : vector<1x8x362xbf16> to vector<8x362xbf16>
    %57 = vector.extract_strided_slice %56 {offsets = [0, 0], sizes = [8, 324], strides = [1, 1]} : vector<8x362xbf16> to vector<8x324xbf16>
    %c0_53 = arith.constant 0 : index
    %c324 = arith.constant 324 : index
    %58 = vector.load %arg7[%c0_53, %c324] : memref<72x1296xbf16, #tpu.memory_space<vmem>>, vector<8x324xbf16>
    tpu.vector_store %arg7[%c0_53, %c324], %57 {strides = array<i32>} : memref<72x1296xbf16, #tpu.memory_space<vmem>>, vector<8x324xbf16>,
    %59 = vector.extract_strided_slice %56 {offsets = [0, 1], sizes = [8, 324], strides = [1, 1]} : vector<8x362xbf16> to vector<8x324xbf16>
    %c8_54 = arith.constant 8 : index
    %c324_55 = arith.constant 324 : index
    %60 = vector.load %arg7[%c8_54, %c324_55] : memref<72x1296xbf16, #tpu.memory_space<vmem>>, vector<8x324xbf16>
    tpu.vector_store %arg7[%c8_54, %c324_55], %59 {strides = array<i32>} : memref<72x1296xbf16, #tpu.memory_space<vmem>>, vector<8x324xbf16>,
    %61 = vector.extract_strided_slice %56 {offsets = [0, 2], sizes = [8, 324], strides = [1, 1]} : vector<8x362xbf16> to vector<8x324xbf16>
    %c16_56 = arith.constant 16 : index
    %c324_57 = arith.constant 324 : index
    %62 = vector.load %arg7[%c16_56, %c324_57] : memref<72x1296xbf16, #tpu.memory_space<vmem>>, vector<8x324xbf16>
    tpu.vector_store %arg7[%c16_56, %c324_57], %61 {strides = array<i32>} : memref<72x1296xbf16, #tpu.memory_space<vmem>>, vector<8x324xbf16>,
    %63 = vector.extract_strided_slice %56 {offsets = [0, 18], sizes = [8, 324], strides = [1, 1]} : vector<8x362xbf16> to vector<8x324xbf16>
    %c24_58 = arith.constant 24 : index
    %c324_59 = arith.constant 324 : index
    %64 = vector.load %arg7[%c24_58, %c324_59] : memref<72x1296xbf16, #tpu.memory_space<vmem>>, vector<8x324xbf16>
    tpu.vector_store %arg7[%c24_58, %c324_59], %63 {strides = array<i32>} : memref<72x1296xbf16, #tpu.memory_space<vmem>>, vector<8x324xbf16>,
    %65 = vector.extract_strided_slice %56 {offsets = [0, 19], sizes = [8, 324], strides = [1, 1]} : vector<8x362xbf16> to vector<8x324xbf16>
    %c32_60 = arith.constant 32 : index
    %c324_61 = arith.constant 324 : index
    %66 = vector.load %arg7[%c32_60, %c324_61] : memref<72x1296xbf16, #tpu.memory_space<vmem>>, vector<8x324xbf16>
    tpu.vector_store %arg7[%c32_60, %c324_61], %65 {strides = array<i32>} : memref<72x1296xbf16, #tpu.memory_space<vmem>>, vector<8x324xbf16>,
    %67 = vector.extract_strided_slice %56 {offsets = [0, 20], sizes = [8, 324], strides = [1, 1]} : vector<8x362xbf16> to vector<8x324xbf16>
    %c40_62 = arith.constant 40 : index
    %c324_63 = arith.constant 324 : index
    %68 = vector.load %arg7[%c40_62, %c324_63] : memref<72x1296xbf16, #tpu.memory_space<vmem>>, vector<8x324xbf16>
    tpu.vector_store %arg7[%c40_62, %c324_63], %67 {strides = array<i32>} : memref<72x1296xbf16, #tpu.memory_space<vmem>>, vector<8x324xbf16>,
    %69 = vector.extract_strided_slice %56 {offsets = [0, 36], sizes = [8, 324], strides = [1, 1]} : vector<8x362xbf16> to vector<8x324xbf16>
    %c48_64 = arith.constant 48 : index
    %c324_65 = arith.constant 324 : index
    %70 = vector.load %arg7[%c48_64, %c324_65] : memref<72x1296xbf16, #tpu.memory_space<vmem>>, vector<8x324xbf16>
    tpu.vector_store %arg7[%c48_64, %c324_65], %69 {strides = array<i32>} : memref<72x1296xbf16, #tpu.memory_space<vmem>>, vector<8x324xbf16>,
    %71 = vector.extract_strided_slice %56 {offsets = [0, 37], sizes = [8, 324], strides = [1, 1]} : vector<8x362xbf16> to vector<8x324xbf16>
    %c56_66 = arith.constant 56 : index
    %c324_67 = arith.constant 324 : index
    %72 = vector.load %arg7[%c56_66, %c324_67] : memref<72x1296xbf16, #tpu.memory_space<vmem>>, vector<8x324xbf16>
    tpu.vector_store %arg7[%c56_66, %c324_67], %71 {strides = array<i32>} : memref<72x1296xbf16, #tpu.memory_space<vmem>>, vector<8x324xbf16>,
    %73 = vector.extract_strided_slice %56 {offsets = [0, 38], sizes = [8, 324], strides = [1, 1]} : vector<8x362xbf16> to vector<8x324xbf16>
    %c64_68 = arith.constant 64 : index
    %c324_69 = arith.constant 324 : index
    %74 = vector.load %arg7[%c64_68, %c324_69] : memref<72x1296xbf16, #tpu.memory_space<vmem>>, vector<8x324xbf16>
    tpu.vector_store %arg7[%c64_68, %c324_69], %73 {strides = array<i32>} : memref<72x1296xbf16, #tpu.memory_space<vmem>>, vector<8x324xbf16>,
    %c2 = arith.constant 2 : index
    %c0_70 = arith.constant 0 : index
    %c0_71 = arith.constant 0 : index
    %75 = vector.load %arg6[%c2, %c0_70, %c0_71] : memref<4x8x362xbf16, #tpu.memory_space<vmem>>, vector<1x8x362xbf16>
    %76 = vector.shape_cast %75 : vector<1x8x362xbf16> to vector<8x362xbf16>
    %77 = vector.extract_strided_slice %76 {offsets = [0, 0], sizes = [8, 324], strides = [1, 1]} : vector<8x362xbf16> to vector<8x324xbf16>
    %c0_72 = arith.constant 0 : index
    %c648 = arith.constant 648 : index
    %78 = vector.load %arg7[%c0_72, %c648] : memref<72x1296xbf16, #tpu.memory_space<vmem>>, vector<8x324xbf16>
    tpu.vector_store %arg7[%c0_72, %c648], %77 {strides = array<i32>} : memref<72x1296xbf16, #tpu.memory_space<vmem>>, vector<8x324xbf16>,
    %79 = vector.extract_strided_slice %76 {offsets = [0, 1], sizes = [8, 324], strides = [1, 1]} : vector<8x362xbf16> to vector<8x324xbf16>
    %c8_73 = arith.constant 8 : index
    %c648_74 = arith.constant 648 : index
    %80 = vector.load %arg7[%c8_73, %c648_74] : memref<72x1296xbf16, #tpu.memory_space<vmem>>, vector<8x324xbf16>
    tpu.vector_store %arg7[%c8_73, %c648_74], %79 {strides = array<i32>} : memref<72x1296xbf16, #tpu.memory_space<vmem>>, vector<8x324xbf16>,
    %81 = vector.extract_strided_slice %76 {offsets = [0, 2], sizes = [8, 324], strides = [1, 1]} : vector<8x362xbf16> to vector<8x324xbf16>
    %c16_75 = arith.constant 16 : index
    %c648_76 = arith.constant 648 : index
    %82 = vector.load %arg7[%c16_75, %c648_76] : memref<72x1296xbf16, #tpu.memory_space<vmem>>, vector<8x324xbf16>
    tpu.vector_store %arg7[%c16_75, %c648_76], %81 {strides = array<i32>} : memref<72x1296xbf16, #tpu.memory_space<vmem>>, vector<8x324xbf16>,
    %83 = vector.extract_strided_slice %76 {offsets = [0, 18], sizes = [8, 324], strides = [1, 1]} : vector<8x362xbf16> to vector<8x324xbf16>
    %c24_77 = arith.constant 24 : index
    %c648_78 = arith.constant 648 : index
    %84 = vector.load %arg7[%c24_77, %c648_78] : memref<72x1296xbf16, #tpu.memory_space<vmem>>, vector<8x324xbf16>
    tpu.vector_store %arg7[%c24_77, %c648_78], %83 {strides = array<i32>} : memref<72x1296xbf16, #tpu.memory_space<vmem>>, vector<8x324xbf16>,
    %85 = vector.extract_strided_slice %76 {offsets = [0, 19], sizes = [8, 324], strides = [1, 1]} : vector<8x362xbf16> to vector<8x324xbf16>
    %c32_79 = arith.constant 32 : index
    %c648_80 = arith.constant 648 : index
    %86 = vector.load %arg7[%c32_79, %c648_80] : memref<72x1296xbf16, #tpu.memory_space<vmem>>, vector<8x324xbf16>
    tpu.vector_store %arg7[%c32_79, %c648_80], %85 {strides = array<i32>} : memref<72x1296xbf16, #tpu.memory_space<vmem>>, vector<8x324xbf16>,
    %87 = vector.extract_strided_slice %76 {offsets = [0, 20], sizes = [8, 324], strides = [1, 1]} : vector<8x362xbf16> to vector<8x324xbf16>
    %c40_81 = arith.constant 40 : index
    %c648_82 = arith.constant 648 : index
    %88 = vector.load %arg7[%c40_81, %c648_82] : memref<72x1296xbf16, #tpu.memory_space<vmem>>, vector<8x324xbf16>
    tpu.vector_store %arg7[%c40_81, %c648_82], %87 {strides = array<i32>} : memref<72x1296xbf16, #tpu.memory_space<vmem>>, vector<8x324xbf16>,
    %89 = vector.extract_strided_slice %76 {offsets = [0, 36], sizes = [8, 324], strides = [1, 1]} : vector<8x362xbf16> to vector<8x324xbf16>
    %c48_83 = arith.constant 48 : index
    %c648_84 = arith.constant 648 : index
    %90 = vector.load %arg7[%c48_83, %c648_84] : memref<72x1296xbf16, #tpu.memory_space<vmem>>, vector<8x324xbf16>
    tpu.vector_store %arg7[%c48_83, %c648_84], %89 {strides = array<i32>} : memref<72x1296xbf16, #tpu.memory_space<vmem>>, vector<8x324xbf16>,
    %91 = vector.extract_strided_slice %76 {offsets = [0, 37], sizes = [8, 324], strides = [1, 1]} : vector<8x362xbf16> to vector<8x324xbf16>
    %c56_85 = arith.constant 56 : index
    %c648_86 = arith.constant 648 : index
    %92 = vector.load %arg7[%c56_85, %c648_86] : memref<72x1296xbf16, #tpu.memory_space<vmem>>, vector<8x324xbf16>
    tpu.vector_store %arg7[%c56_85, %c648_86], %91 {strides = array<i32>} : memref<72x1296xbf16, #tpu.memory_space<vmem>>, vector<8x324xbf16>,
    %93 = vector.extract_strided_slice %76 {offsets = [0, 38], sizes = [8, 324], strides = [1, 1]} : vector<8x362xbf16> to vector<8x324xbf16>
    %c64_87 = arith.constant 64 : index
    %c648_88 = arith.constant 648 : index
    %94 = vector.load %arg7[%c64_87, %c648_88] : memref<72x1296xbf16, #tpu.memory_space<vmem>>, vector<8x324xbf16>
    tpu.vector_store %arg7[%c64_87, %c648_88], %93 {strides = array<i32>} : memref<72x1296xbf16, #tpu.memory_space<vmem>>, vector<8x324xbf16>,
    %c3 = arith.constant 3 : index
    %c0_89 = arith.constant 0 : index
    %c0_90 = arith.constant 0 : index
    %95 = vector.load %arg6[%c3, %c0_89, %c0_90] : memref<4x8x362xbf16, #tpu.memory_space<vmem>>, vector<1x8x362xbf16>
    %96 = vector.shape_cast %95 : vector<1x8x362xbf16> to vector<8x362xbf16>
    %97 = vector.extract_strided_slice %96 {offsets = [0, 0], sizes = [8, 324], strides = [1, 1]} : vector<8x362xbf16> to vector<8x324xbf16>
    %c0_91 = arith.constant 0 : index
    %c972 = arith.constant 972 : index
    %98 = vector.load %arg7[%c0_91, %c972] : memref<72x1296xbf16, #tpu.memory_space<vmem>>, vector<8x324xbf16>
    tpu.vector_store %arg7[%c0_91, %c972], %97 {strides = array<i32>} : memref<72x1296xbf16, #tpu.memory_space<vmem>>, vector<8x324xbf16>,
    %99 = vector.extract_strided_slice %96 {offsets = [0, 1], sizes = [8, 324], strides = [1, 1]} : vector<8x362xbf16> to vector<8x324xbf16>
    %c8_92 = arith.constant 8 : index
    %c972_93 = arith.constant 972 : index
    %100 = vector.load %arg7[%c8_92, %c972_93] : memref<72x1296xbf16, #tpu.memory_space<vmem>>, vector<8x324xbf16>
    tpu.vector_store %arg7[%c8_92, %c972_93], %99 {strides = array<i32>} : memref<72x1296xbf16, #tpu.memory_space<vmem>>, vector<8x324xbf16>,
    %101 = vector.extract_strided_slice %96 {offsets = [0, 2], sizes = [8, 324], strides = [1, 1]} : vector<8x362xbf16> to vector<8x324xbf16>
    %c16_94 = arith.constant 16 : index
    %c972_95 = arith.constant 972 : index
    %102 = vector.load %arg7[%c16_94, %c972_95] : memref<72x1296xbf16, #tpu.memory_space<vmem>>, vector<8x324xbf16>
    tpu.vector_store %arg7[%c16_94, %c972_95], %101 {strides = array<i32>} : memref<72x1296xbf16, #tpu.memory_space<vmem>>, vector<8x324xbf16>,
    %103 = vector.extract_strided_slice %96 {offsets = [0, 18], sizes = [8, 324], strides = [1, 1]} : vector<8x362xbf16> to vector<8x324xbf16>
    %c24_96 = arith.constant 24 : index
    %c972_97 = arith.constant 972 : index
    %104 = vector.load %arg7[%c24_96, %c972_97] : memref<72x1296xbf16, #tpu.memory_space<vmem>>, vector<8x324xbf16>
    tpu.vector_store %arg7[%c24_96, %c972_97], %103 {strides = array<i32>} : memref<72x1296xbf16, #tpu.memory_space<vmem>>, vector<8x324xbf16>,
    %105 = vector.extract_strided_slice %96 {offsets = [0, 19], sizes = [8, 324], strides = [1, 1]} : vector<8x362xbf16> to vector<8x324xbf16>
    %c32_98 = arith.constant 32 : index
    %c972_99 = arith.constant 972 : index
    %106 = vector.load %arg7[%c32_98, %c972_99] : memref<72x1296xbf16, #tpu.memory_space<vmem>>, vector<8x324xbf16>
    tpu.vector_store %arg7[%c32_98, %c972_99], %105 {strides = array<i32>} : memref<72x1296xbf16, #tpu.memory_space<vmem>>, vector<8x324xbf16>,
    %107 = vector.extract_strided_slice %96 {offsets = [0, 20], sizes = [8, 324], strides = [1, 1]} : vector<8x362xbf16> to vector<8x324xbf16>
    %c40_100 = arith.constant 40 : index
    %c972_101 = arith.constant 972 : index
    %108 = vector.load %arg7[%c40_100, %c972_101] : memref<72x1296xbf16, #tpu.memory_space<vmem>>, vector<8x324xbf16>
    tpu.vector_store %arg7[%c40_100, %c972_101], %107 {strides = array<i32>} : memref<72x1296xbf16, #tpu.memory_space<vmem>>, vector<8x324xbf16>,
    %109 = vector.extract_strided_slice %96 {offsets = [0, 36], sizes = [8, 324], strides = [1, 1]} : vector<8x362xbf16> to vector<8x324xbf16>
    %c48_102 = arith.constant 48 : index
    %c972_103 = arith.constant 972 : index
    %110 = vector.load %arg7[%c48_102, %c972_103] : memref<72x1296xbf16, #tpu.memory_space<vmem>>, vector<8x324xbf16>
    tpu.vector_store %arg7[%c48_102, %c972_103], %109 {strides = array<i32>} : memref<72x1296xbf16, #tpu.memory_space<vmem>>, vector<8x324xbf16>,
    %111 = vector.extract_strided_slice %96 {offsets = [0, 37], sizes = [8, 324], strides = [1, 1]} : vector<8x362xbf16> to vector<8x324xbf16>
    %c56_104 = arith.constant 56 : index
    %c972_105 = arith.constant 972 : index
    %112 = vector.load %arg7[%c56_104, %c972_105] : memref<72x1296xbf16, #tpu.memory_space<vmem>>, vector<8x324xbf16>
    tpu.vector_store %arg7[%c56_104, %c972_105], %111 {strides = array<i32>} : memref<72x1296xbf16, #tpu.memory_space<vmem>>, vector<8x324xbf16>,
    %113 = vector.extract_strided_slice %96 {offsets = [0, 38], sizes = [8, 324], strides = [1, 1]} : vector<8x362xbf16> to vector<8x324xbf16>
    %c64_106 = arith.constant 64 : index
    %c972_107 = arith.constant 972 : index
    %114 = vector.load %arg7[%c64_106, %c972_107] : memref<72x1296xbf16, #tpu.memory_space<vmem>>, vector<8x324xbf16>
    tpu.vector_store %arg7[%c64_106, %c972_107], %113 {strides = array<i32>} : memref<72x1296xbf16, #tpu.memory_space<vmem>>, vector<8x324xbf16>,
    %c0_108 = arith.constant 0 : index
    %c0_109 = arith.constant 0 : index
    %115 = vector.load %arg2[%c0_108, %c0_109] : memref<8x72xbf16, #tpu.memory_space<vmem>>, vector<8x72xbf16>
    %c0_110 = arith.constant 0 : index
    %c0_111 = arith.constant 0 : index
    %116 = vector.load %arg7[%c0_110, %c0_111] : memref<72x1296xbf16, #tpu.memory_space<vmem>>, vector<72x1296xbf16>
    %cst_112 = arith.constant dense<0.000000e+00> : vector<8x1296xf32>
    %117 = tpu.matmul %115, %116, %cst_112 {dimension_numbers = #tpu.dot_dimension_numbers<[1], [0], [0], [1], [0, 0, 1, 1], [], []>} : vector<8x72xbf16>, vector<72x1296xbf16>, vector<8x1296xf32> -> vector<8x1296xf32>
    %c0_113 = arith.constant 0 : index
    %c0_114 = arith.constant 0 : index
    %118 = vector.load %arg3[%c0_113, %c0_114] : memref<8x1xf32, #tpu.memory_space<vmem>>, vector<8x1xf32>
    %119 = vector.broadcast %118 : vector<8x1xf32> to vector<8x1296xf32>
    %120 = arith.addf %117, %119 : vector<8x1296xf32>
    %cst_115 = arith.constant 0.000000e+00 : f32
    %121 = vector.broadcast %cst_115 : f32 to vector<8x1296xf32>
    %122 = arith.maximumf %120, %121 : vector<8x1296xf32>
    %c0_116 = arith.constant 0 : index
    %c0_117 = arith.constant 0 : index
    %123 = vector.load %arg4[%c0_116, %c0_117] : memref<1296x4xf32, #tpu.memory_space<vmem>>, vector<1296x4xf32>
    %cst_118 = arith.constant dense<0.000000e+00> : vector<8x4xf32>
    %124 = tpu.matmul %122, %123, %cst_118 {dimension_numbers = #tpu.dot_dimension_numbers<[1], [0], [0], [1], [0, 0, 1, 1], [], []>} : vector<8x1296xf32>, vector<1296x4xf32>, vector<8x4xf32> -> vector<8x4xf32>
    %125 = tpu.transpose %124, [1, 0] : vector<8x4xf32> -> vector<4x8xf32>
    %c0_119 = arith.constant 0 : index
    %c0_120 = arith.constant 0 : index
    %126 = vector.load %arg5[%c0_119, %c0_120] : memref<4x8xf32, #tpu.memory_space<vmem>>, vector<4x8xf32>
    tpu.vector_store %arg5[%c0_119, %c0_120], %125 {strides = array<i32>} : memref<4x8xf32, #tpu.memory_space<vmem>>, vector<4x8xf32>,
    return
  }
  func.func @transform_0(%arg0: i32) -> (i32, i32, i32) {
    %c0_i32 = arith.constant 0 : i32
    %c0_i32_0 = arith.constant 0 : i32
    %c0_i32_1 = arith.constant 0 : i32
    return %arg0, %c0_i32, %c0_i32_0 : i32, i32, i32
  }
  func.func @transform_1(%arg0: i32) -> (i32, i32) {
    %c0_i32 = arith.constant 0 : i32
    %c0_i32_0 = arith.constant 0 : i32
    %c0_i32_1 = arith.constant 0 : i32
    return %c0_i32, %c0_i32_0 : i32, i32
  }
  func.func @transform_2(%arg0: i32) -> (i32, i32) {
    %c0_i32 = arith.constant 0 : i32
    %c0_i32_0 = arith.constant 0 : i32
    %c0_i32_1 = arith.constant 0 : i32
    return %c0_i32, %c0_i32_0 : i32, i32
  }
  func.func @transform_3(%arg0: i32) -> (i32, i32) {
    %c0_i32 = arith.constant 0 : i32
    %c0_i32_0 = arith.constant 0 : i32
    %c0_i32_1 = arith.constant 0 : i32
    return %c0_i32, %c0_i32_0 : i32, i32
  }
  func.func @transform_4(%arg0: i32) -> (i32, i32) {
    %c0_i32 = arith.constant 0 : i32
    %c0_i32_0 = arith.constant 0 : i32
    return %arg0, %c0_i32 : i32, i32
  }
}

</mosaic_0001>

<bundles_post_ra>
// kernel: tpu_custom_call.1
= control target key start
LH: loop header
LB: loop body
LE: loop exit
PB: predicated region body
PF: predicated region fallthrough
CT: control target
= control target key end

     0   :  { %s2710_s17 = smov 50   ;;  %s2711_s18 = smov 48   ;;  %v2712_v1 = vmov 0   ;;  %vm20_vm0 = vcmask 863232   ;;  %s3881_s0 = inlined_call_operand.vmem [shape: bf16[4,4,256], index: 0, kind: input, shape index: {}]   ;;  %s3882_s1 = inlined_call_operand.vmem [shape: bf16[8,72], index: 1, kind: input, shape index: {}]   ;;  %s3883_s2 = inlined_call_operand.vmem [shape: f32[8,1], index: 2, kind: input, shape index: {}]   ;;  %s3884_s3 = inlined_call_operand.vmem [shape: f32[1296,4], index: 3, kind: input, shape index: {}]   ;;  %s3885_s4 = inlined_call_operand.hbm [shape: f32[4,8], index: 4, kind: output, shape index: {}]  }
   0x1   :  { %v2139_v0 = vld.sshfl [vmem:[%s3881_s0] sm:$0x33 pattern:$0x76325410]  ;;  %19 = vst [vmem:[#allocation2] sm:$0xff] %v2712_v1  ;;  %22 = vst [vmem:[#allocation2 + $0xc] sm:$0xff] %v2712_v1  ;;  %1281 = vmatprep.mubr.bf16.mxu1 %v2712_v1  ;;  %1363 = vmatprep.mubr.bf16.mxu0 %v2712_v1 }
   0x2   :  { %166 = vrot.lane.b32.xlu1 %v2139_v0, %s2710_s17  ;;  %149 = vrot.lane.b32.xlu0 %v2139_v0, %s2711_s18  ;;  %24 = vst [vmem:[#allocation2 + $0x18] sm:$0xff] %v2712_v1  ;;  %26 = vst [vmem:[#allocation2 + $0x24] sm:$0xff] %v2712_v1  ;;  %s2713_s19 = smov 56   ;;  %s2714_s20 = smov 54  }
   0x3   :  { %2626 = vset.pattern.permute.xlu0 %v2712_v1  ;;  %s2715_s21 = smov 58   ;;  %s2716_s22 = smov 52   ;;  %21 = vst.msk [vmem:[#allocation2 + $0x8] sm:$0xf] %vm20_vm0, %v2712_v1  ;;  %23 = vst.msk [vmem:[#allocation2 + $0x14] sm:$0xf] %vm20_vm0, %v2712_v1 }
   0x4   :  { %25 = vst.msk [vmem:[#allocation2 + $0x20] sm:$0xf] %vm20_vm0, %v2712_v1  ;;  %27 = vst.msk [vmem:[#allocation2 + $0x2c] sm:$0xf] %vm20_vm0, %v2712_v1 }
   0x6   :  { %226 = vrot.lane.b32.xlu1 %v2139_v0, %s2713_s19  ;;  %200 = vrot.lane.b32.xlu0 %v2139_v0, %s2714_s20 }
   0xa   :  { %252 = vrot.lane.b32.xlu1 %v2139_v0, %s2715_s21  ;;  %183 = vrot.lane.b32.xlu0 %v2139_v0, %s2716_s22 }
   0xb   :  { %9 = vsyncpa [#allocation5], 0  ;;  %s2717_s23 = smov 62   ;;  %s2718_s24 = smov 60   ;;  %vm161_vm1 = vcmask 123904   ;;  %vm178_vm2 = vcmask 271504  }
   0xc   :  { %s2719_s25 = smov 64   ;;  %s2720_s26 = smov 38   ;;  %v2140_v2 = vld.sshfl [vmem:[%s3881_s0 + $0x4] sm:$0x33 pattern:$0x76325410] }
   0xd   :  { %s2721_s27 = smov 66   ;;  %s2722_s28 = smov 40   ;;  %v2141_v3 = vld.sshfl [vmem:[%s3881_s0 + $0x8] sm:$0x33 pattern:$0x76325410] }
   0xe   :  { %304 = vrot.lane.b32.xlu1 %v2139_v0, %s2717_s23  ;;  %278 = vrot.lane.b32.xlu0 %v2139_v0, %s2718_s24  ;;  %s2723_s29 = smov 68   ;;  %s2724_s30 = smov 42   ;;  %v2142_v4 = vld.sshfl [vmem:[%s3881_s0 + $0xc] sm:$0x33 pattern:$0x76325410] }
   0xf   :  { %s2725_s5 = smov 46   ;;  %s2726_s6 = smov 44   ;;  %vm238_vm3 = vcmask 457728   ;;  %vm212_vm4 = vcmask 441344   ;;  %vm195_vm5 = vcmask 419104   ;;  %vm221_vm6 = vcmask 566704  }
  0x10   :  { %vm3896_vm7 = vcmask 474112   ;;  %vm3886_vm8 = vcmask 714304   ;;  %vm3897_vm9 = vcmask 861904   ;;  %vm325_vm10 = vcmask 1042416   ;;  %s2727_s0 = smov 127   ;;  %s2728_s13 = smov 126  }
  0x11   :  { %vm326_vm11 = vcmask 111620   ;;  %vm3889_vm12 = vcmask 506880   ;;  %vm3887_vm13 = vcmask 490496   ;;  %vm3888_vm14 = vcmask 1009504   ;;  %s2729_s14 = smov 110   ;;  %s2730_s15 = smov 109  }
  0x12   :  { %332 = vrot.lane.b32.xlu1 %v2139_v0, %s2719_s25  ;;  %64 = vrot.lane.b32.xlu0 %v2139_v0, %s2720_s26  ;;  %vm2879_vm15 = vmor %vm326_vm11, %vm325_vm10  ;;  %vm3890_vm0 = vcmask 435504   ;;  %vm3891_vm10 = vcmask 583104   ;;  %vm369_vm11 = vcmask 402704   ;;  %s2731_s16 = smov 108   ;;  %s2743_s7 = smov 32  }
  0x13   :  { %s2744_s8 = smov 31   ;;  %s2745_s9 = smov 100  }
  0x14   :  { %s2747_s10 = smov 30   ;;  %s2748_s11 = smov 98  }
  0x15   :  { %s2749_s12 = smov 76  }
  0x16   :  { %353 = vrot.lane.b32.xlu1 %v2139_v0, %s2721_s27  ;;  %81 = vrot.lane.b32.xlu0 %v2139_v0, %s2722_s28 }
  0x1a   :  { %374 = vrot.lane.b32.xlu1 %v2139_v0, %s2723_s29  ;;  %98 = vrot.lane.b32.xlu0 %v2139_v0, %s2724_s30 }
  0x1e   :  { %132 = vrot.lane.b32.xlu1 %v2139_v0, %s2725_s5  ;;  %115 = vrot.lane.b32.xlu0 %v2139_v0, %s2726_s6 }
  0x22   :  { %202 = vrot.lane.b32.xlu1 %v2140_v2, %s2714_s20  ;;  %151 = vrot.lane.b32.xlu0 %v2140_v2, %s2711_s18 }
  0x26   :  { %228 = vrot.lane.b32.xlu1 %v2140_v2, %s2713_s19  ;;  %168 = vrot.lane.b32.xlu0 %v2140_v2, %s2710_s17 }
  0x2a   :  { %254 = vrot.lane.b32.xlu1 %v2140_v2, %s2715_s21  ;;  %185 = vrot.lane.b32.xlu0 %v2140_v2, %s2716_s22 }
  0x2e   :  { %306 = vrot.lane.b32.xlu1 %v2140_v2, %s2717_s23  ;;  %280 = vrot.lane.b32.xlu0 %v2140_v2, %s2718_s24 }
  0x32   :  { %204 = vrot.lane.b32.xlu1 %v2141_v3, %s2714_s20  ;;  %153 = vrot.lane.b32.xlu0 %v2141_v3, %s2711_s18 }
  0x36   :  { %170 = vrot.lane.b32.xlu1 %v2141_v3, %s2710_s17  ;;  %66 = vrot.lane.b32.xlu0 %v2140_v2, %s2720_s26 }
  0x3a   :  { %334 = vrot.lane.b32.xlu1 %v2140_v2, %s2719_s25  ;;  %230 = vrot.lane.b32.xlu0 %v2141_v3, %s2713_s19 }
  0x3e   :  { %187 = vrot.lane.b32.xlu1 %v2141_v3, %s2716_s22  ;;  %83 = vrot.lane.b32.xlu0 %v2140_v2, %s2722_s28 }
  0x42   :  { %355 = vrot.lane.b32.xlu1 %v2140_v2, %s2721_s27  ;;  %256 = vrot.lane.b32.xlu0 %v2141_v3, %s2715_s21 }
  0x46   :  { %100 = vrot.lane.b32.xlu1 %v2140_v2, %s2724_s30  ;;  %68 = vrot.lane.b32.xlu0 %v2141_v3, %s2720_s26 }
  0x4a   :  { %376 = vrot.lane.b32.xlu1 %v2140_v2, %s2723_s29  ;;  %282 = vrot.lane.b32.xlu0 %v2141_v3, %s2718_s24 }
  0x4e   :  { %117 = vrot.lane.b32.xlu1 %v2140_v2, %s2726_s6  ;;  %85 = vrot.lane.b32.xlu0 %v2141_v3, %s2722_s28 }
  0x52   :  { %102 = vrot.lane.b32.xlu1 %v2141_v3, %s2724_s30  ;;  %308 = vrot.lane.b32.xlu0 %v2141_v3, %s2717_s23 }
  0x56   :  { %119 = vrot.lane.b32.xlu1 %v2141_v3, %s2726_s6  ;;  %134 = vrot.lane.b32.xlu0 %v2140_v2, %s2725_s5 }
  0x5a   :  { %136 = vrot.lane.b32.xlu1 %v2141_v3, %s2725_s5  ;;  %336 = vrot.lane.b32.xlu0 %v2141_v3, %s2719_s25 }
  0x5e   :  { %357 = vrot.lane.b32.xlu0 %v2141_v3, %s2721_s27  ;;  %378 = vrot.lane.b32.xlu1 %v2141_v3, %s2723_s29 }
  0x62   :  { %206 = vrot.lane.b32.xlu1 %v2142_v4, %s2714_s20  ;;  %155 = vrot.lane.b32.xlu0 %v2142_v4, %s2711_s18  ;;  %s2732_s20 = smov 92  }
  0x66   :  { %232 = vrot.lane.b32.xlu1 %v2142_v4, %s2713_s19  ;;  %172 = vrot.lane.b32.xlu0 %v2142_v4, %s2710_s17 }
  0x6a   :  { %258 = vrot.lane.b32.xlu1 %v2142_v4, %s2715_s21  ;;  %189 = vrot.lane.b32.xlu0 %v2142_v4, %s2716_s22  ;;  %s2733_s22 = smov 91  }
  0x6e   :  { %284 = vrot.lane.b32.xlu1 %v2142_v4, %s2718_s24  ;;  %70 = vrot.lane.b32.xlu0 %v2142_v4, %s2720_s26  ;;  %s2735_s24 = smov 67  }
  0x72   :  { %310 = vrot.lane.b32.xlu1 %v2142_v4, %s2717_s23  ;;  %87 = vrot.lane.b32.xlu0 %v2142_v4, %s2722_s28  ;;  %s2734_s23 = smov 90  }
  0x74   :  { %v167_v5 = vpop.permute.xlu1 %166  ;;  %v150_v6 = vpop.permute.xlu0 %149 }
  0x75   :  { %162 = vst.msk [vmem:[#allocation2 + $0x4] sm:$0x3] %vm161_vm1, %v150_v6 }
  0x76   :  { %179 = vst.msk [vmem:[#allocation2 + $0x4] sm:$0x3] %vm178_vm2, %v167_v5  ;;  %121 = vrot.lane.b32.xlu1 %v2142_v4, %s2726_s6  ;;  %104 = vrot.lane.b32.xlu0 %v2142_v4, %s2724_s30  ;;  %s2738_s30 = smov 118   ;;  %s2742_s6 = smov 116  }
  0x78   :  { %v227_v7 = vpop.permute.xlu1 %226  ;;  %v201_v8 = vpop.permute.xlu0 %200 }
  0x79   :  { %v234_v9 = vrot.slane %v227_v7, 4  ;;  %v208_v10 = vrot.slane %v201_v8, 4 }
  0x7a   :  { %338 = vrot.lane.b32.xlu1 %v2142_v4, %s2719_s25  ;;  %138 = vrot.lane.b32.xlu0 %v2142_v4, %s2725_s5  ;;  %s2736_s25 = smov 7   ;;  %s2741_s5 = smov 117  }
  0x7b   :  { %v239_v11 = vsel %vm238_vm3, %v227_v7, %v234_v9  ;;  %v213_v14 = vsel %vm212_vm4, %v201_v8, %v208_v10 }
  0x7c   :  { %v253_v12 = vpop.permute.xlu1 %252  ;;  %v184_v13 = vpop.permute.xlu0 %183 }
  0x7d   :  { %v260_v15 = vrot.slane %v253_v12, 4  ;;  %196 = vst.msk [vmem:[#allocation2 + $0x4] sm:$0x3] %vm195_vm5, %v184_v13 }
  0x7e   :  { %222 = vst.msk [vmem:[#allocation2 + $0x4] sm:$0x3] %vm221_vm6, %v213_v14  ;;  %380 = vrot.lane.b32.xlu1 %v2142_v4, %s2723_s29  ;;  %359 = vrot.lane.b32.xlu0 %v2142_v4, %s2721_s27 }
  0x7f   :  { %v265_v16 = vsel %vm3896_vm7, %v253_v12, %v260_v15  ;;  %248 = vst.msk [vmem:[#allocation2 + $0x4] sm:$0x3] %vm3886_vm8, %v239_v11  ;;  %vm348_vm8 = vcmask 255104  }
  0x80   :  { %v305_v17 = vpop.permute.xlu1 %304  ;;  %v279_v18 = vpop.permute.xlu0 %278  ;;  %274 = vst.msk [vmem:[#allocation2 + $0x4] sm:$0x3] %vm3897_vm9, %v265_v16 }
  0x81   :  { %v312_v19 = vrot.slane %v305_v17, 4  ;;  %v286_v20 = vrot.slane %v279_v18, 4 }
  0x83   :  { %v317_v22 = vsel %vm3889_vm12, %v305_v17, %v312_v19  ;;  %v291_v23 = vsel %vm3887_vm13, %v279_v18, %v286_v20  ;;  %vm110_vm13 = vcmask 730704   ;;  %vm3894_vm12 = vcmask 878304  }
  0x84   :  { %300 = vst.msk [vmem:[#allocation2 + $0x4] sm:$0x3] %vm3888_vm14, %v291_v23  ;;  %v333_v24 = vpop.permute.xlu1 %332  ;;  %v65_v25 = vpop.permute.xlu0 %64  ;;  %vm3895_vm14 = vcmask 550304  }
  0x85   :  { %328 = vst.msk [vmem:[#allocation2 + $0x4] sm:$0x33] %vm2879_vm15, %v317_v22  ;;  %v340_v26 = vrot.slane %v333_v24, 4 }
  0x86   :  { %77 = vst.msk [vmem:[#allocation2] sm:$0x3] %vm3890_vm0, %v65_v25  ;;  %vm3893_vm0 = vcmask 1025904  }
  0x87   :  { %349 = vst.msk [vmem:[#allocation2 + $0x8] sm:$0x3] %vm348_vm8, %v340_v26 }
  0x88   :  { %v354_v27 = vpop.permute.xlu1 %353  ;;  %v82_v28 = vpop.permute.xlu0 %81 }
  0x89   :  { %v361_v29 = vrot.slane %v354_v27, 4  ;;  %94 = vst.msk [vmem:[#allocation2] sm:$0x3] %vm3891_vm10, %v82_v28  ;;  %vm3892_vm10 = vcmask 551936  }
  0x8b   :  { %370 = vst.msk [vmem:[#allocation2 + $0x8] sm:$0x3] %vm369_vm11, %v361_v29 }
  0x8c   :  { %v375_v30 = vpop.permute.xlu1 %374  ;;  %v99_v31 = vpop.permute.xlu0 %98 }
  0x8d   :  { %v382_v32 = vrot.slane %v375_v30, 4  ;;  %111 = vst.msk [vmem:[#allocation2] sm:$0x3] %vm110_vm13, %v99_v31 }
  0x8f   :  { %391 = vst.msk [vmem:[#allocation2 + $0x8] sm:$0x3] %vm3895_vm14, %v382_v32  ;;  %vm3903_vm14 = vcmask 1009504  }
  0x90   :  { %v133_v33 = vpop.permute.xlu1 %132  ;;  %v116_v34 = vpop.permute.xlu0 %115 }
  0x91   :  { %128 = vst.msk [vmem:[#allocation2] sm:$0x3] %vm3894_vm12, %v116_v34  ;;  %vm3902_vm12 = vcmask 490496  }
  0x92   :  { %145 = vst.msk [vmem:[#allocation2] sm:$0x3] %vm3893_vm0, %v133_v33  ;;  %vm3901_vm0 = vcmask 506880  }
  0x94   :  { %v203_v35 = vpop.permute.xlu1 %202  ;;  %v152_v36 = vpop.permute.xlu0 %151 }
  0x95   :  { %163 = vst.msk [vmem:[#allocation2 + $0x10] sm:$0x3] %vm161_vm1, %v152_v36  ;;  %v209_v40 = vrot.slane %v203_v35, 4 }
  0x96   :  { %v2897_v37 = vld [vmem:[#allocation2 + $0x8] sm:$0xf] }
  0x97   :  { %404 = vrot.lane.b32.xlu1 %v2897_v37, %s2727_s0  ;;  %399 = vst.msk [vmem:[#allocation3 + $0x8] sm:$0xf] %vm3892_vm10, %v2897_v37  ;;  %v214_v46 = vsel %vm212_vm4, %v203_v35, %v209_v40  ;;  %vm3900_vm10 = vcmask 714304  }
  0x98   :  { %v229_v38 = vpop.permute.xlu1 %228  ;;  %v169_v39 = vpop.permute.xlu0 %168 }
  0x99   :  { %v235_v41 = vrot.slane %v229_v38, 4  ;;  %180 = vst.msk [vmem:[#allocation2 + $0x10] sm:$0x3] %vm178_vm2, %v169_v39  ;;  %v2903_v42 = vld [vmem:[#allocation2] sm:$0xff] }
  0x9a   :  { %402 = vrot.lane.b32.xlu0 %v2903_v42, %s2727_s0  ;;  %s2750_s0 = smov 74  }
  0x9b   :  { %418 = vrot.lane.b32.xlu1 %v2897_v37, %s2728_s13  ;;  %v240_v43 = vsel %vm238_vm3, %v229_v38, %v235_v41 }
  0x9c   :  { %v255_v44 = vpop.permute.xlu1 %254  ;;  %v186_v45 = vpop.permute.xlu0 %185 }
  0x9d   :  { %v261_v47 = vrot.slane %v255_v44, 4  ;;  %197 = vst.msk [vmem:[#allocation2 + $0x10] sm:$0x3] %vm195_vm5, %v186_v45 }
  0x9e   :  { %223 = vst.msk [vmem:[#allocation2 + $0x10] sm:$0x3] %vm221_vm6, %v214_v46  ;;  %416 = vrot.lane.b32.xlu0 %v2903_v42, %s2728_s13  ;;  %s2751_s13 = smov 75  }
  0x9f   :  { %v266_v48 = vsel %vm3896_vm7, %v255_v44, %v261_v47  ;;  %249 = vst.msk [vmem:[#allocation2 + $0x10] sm:$0x3] %vm3900_vm10, %v240_v43  ;;  %431 = vrot.lane.b32.xlu1 %v2897_v37, %s2729_s14 }
  0xa0   :  { %275 = vst.msk [vmem:[#allocation2 + $0x10] sm:$0x3] %vm3897_vm9, %v266_v48  ;;  %v307_v49 = vpop.permute.xlu1 %306  ;;  %v281_v50 = vpop.permute.xlu0 %280 }
  0xa1   :  { %v313_v51 = vrot.slane %v307_v49, 4  ;;  %v287_v52 = vrot.slane %v281_v50, 4 }
  0xa2   :  { %429 = vrot.lane.b32.xlu0 %v2903_v42, %s2729_s14  ;;  %s2752_s14 = smov 57  }
  0xa3   :  { %v318_v53 = vsel %vm3901_vm0, %v307_v49, %v313_v51  ;;  %v292_v54 = vsel %vm3902_vm12, %v281_v50, %v287_v52  ;;  %444 = vrot.lane.b32.xlu1 %v2897_v37, %s2730_s15  ;;  %vm3904_vm12 = vcmask 435504   ;;  %vm3906_vm0 = vmmov %vm3900_vm10 }
  0xa4   :  { %301 = vst.msk [vmem:[#allocation2 + $0x10] sm:$0x3] %vm3903_vm14, %v292_v54  ;;  %v205_v55 = vpop.permute.xlu1 %204  ;;  %v154_v56 = vpop.permute.xlu0 %153  ;;  %vm3905_vm14 = vcmask 583104   ;;  %vm3907_vm10 = vmmov %vm3904_vm12 }
  0xa5   :  { %329 = vst.msk [vmem:[#allocation2 + $0x10] sm:$0x33] %vm2879_vm15, %v318_v53  ;;  %v210_v61 = vrot.slane %v205_v55, 4 }
  0xa6   :  { %164 = vst.msk [vmem:[#allocation2 + $0x1c] sm:$0x3] %vm161_vm1, %v154_v56  ;;  %442 = vrot.lane.b32.xlu0 %v2903_v42, %s2730_s15  ;;  %s2753_s15 = smov 39  }
  0xa7   :  { %457 = vrot.lane.b32.xlu1 %v2897_v37, %s2731_s16  ;;  %v215_v3 = vsel %vm212_vm4, %v205_v55, %v210_v61 }
  0xa8   :  { %v171_v57 = vpop.permute.xlu1 %170  ;;  %v67_v58 = vpop.permute.xlu0 %66 }
  0xa9   :  { %181 = vst.msk [vmem:[#allocation2 + $0x1c] sm:$0x3] %vm178_vm2, %v171_v57 }
  0xaa   :  { %78 = vst.msk [vmem:[#allocation2 + $0xc] sm:$0x3] %vm3904_vm12, %v67_v58  ;;  %455 = vrot.lane.b32.xlu0 %v2903_v42, %s2731_s16  ;;  %vm3908_vm12 = vcmask 550304  }
  0xab   :  { %470 = vrot.lane.b32.xlu1 %v2897_v37, %s2732_s20 }
  0xac   :  { %v335_v59 = vpop.permute.xlu1 %334  ;;  %v231_v60 = vpop.permute.xlu0 %230 }
  0xad   :  { %v341_v62 = vrot.slane %v335_v59, 4  ;;  %v236_v63 = vrot.slane %v231_v60, 4 }
  0xae   :  { %468 = vrot.lane.b32.xlu0 %v2903_v42, %s2732_s20 }
  0xaf   :  { %350 = vst.msk [vmem:[#allocation2 + $0x14] sm:$0x3] %vm348_vm8, %v341_v62  ;;  %483 = vrot.lane.b32.xlu1 %v2897_v37, %s2733_s22  ;;  %v241_v4 = vsel %vm238_vm3, %v231_v60, %v236_v63 }
  0xb0   :  { %v188_v0 = vpop.permute.xlu1 %187  ;;  %v84_v2 = vpop.permute.xlu0 %83 }
  0xb1   :  { %198 = vst.msk [vmem:[#allocation2 + $0x1c] sm:$0x3] %vm195_vm5, %v188_v0 }
  0xb2   :  { %95 = vst.msk [vmem:[#allocation2 + $0xc] sm:$0x3] %vm3905_vm14, %v84_v2  ;;  %481 = vrot.lane.b32.xlu0 %v2903_v42, %s2733_s22  ;;  %vm3909_vm14 = vcmask 490496  }
  0xb3   :  { %224 = vst.msk [vmem:[#allocation2 + $0x1c] sm:$0x3] %vm221_vm6, %v215_v3  ;;  %496 = vrot.lane.b32.xlu1 %v2897_v37, %s2734_s23 }
  0xb4   :  { %250 = vst.msk [vmem:[#allocation2 + $0x1c] sm:$0x3] %vm3906_vm0, %v241_v4  ;;  %v356_v5 = vpop.permute.xlu1 %355  ;;  %v257_v6 = vpop.permute.xlu0 %256  ;;  %vm3910_vm0 = vcmask 1009504  }
  0xb5   :  { %v362_v7 = vrot.slane %v356_v5, 4  ;;  %v262_v8 = vrot.slane %v257_v6, 4 }
  0xb6   :  { %494 = vrot.lane.b32.xlu0 %v2903_v42, %s2734_s23 }
  0xb7   :  { %371 = vst.msk [vmem:[#allocation2 + $0x14] sm:$0x3] %vm369_vm11, %v362_v7  ;;  %v267_v9 = vsel %vm3896_vm7, %v257_v6, %v262_v8  ;;  %vm3911_vm7 = vcmask 878304  }
  0xb8   :  { %276 = vst.msk [vmem:[#allocation2 + $0x1c] sm:$0x3] %vm3897_vm9, %v267_v9  ;;  %v101_v10 = vpop.permute.xlu1 %100  ;;  %v69_v11 = vpop.permute.xlu0 %68  ;;  %vm3912_vm9 = vcmask 583104  }
  0xb9   :  { %112 = vst.msk [vmem:[#allocation2 + $0xc] sm:$0x3] %vm110_vm13, %v101_v10 }
  0xba   :  { %79 = vst.msk [vmem:[#allocation2 + $0x18] sm:$0x3] %vm3907_vm10, %v69_v11  ;;  %vm3913_vm10 = vcmask 506880  }
  0xbc   :  { %v377_v12 = vpop.permute.xlu1 %376  ;;  %v283_v13 = vpop.permute.xlu0 %282 }
  0xbd   :  { %v383_v14 = vrot.slane %v377_v12, 4  ;;  %v288_v15 = vrot.slane %v283_v13, 4 }
  0xbf   :  { %392 = vst.msk [vmem:[#allocation2 + $0x14] sm:$0x3] %vm3908_vm12, %v383_v14  ;;  %v293_v16 = vsel %vm3909_vm14, %v283_v13, %v288_v15  ;;  %vm3916_vm14 = vcmask 550304  }
  0xc0   :  { %302 = vst.msk [vmem:[#allocation2 + $0x1c] sm:$0x3] %vm3910_vm0, %v293_v16  ;;  %v118_v17 = vpop.permute.xlu1 %117  ;;  %v86_v18 = vpop.permute.xlu0 %85  ;;  %vm3921_vm0 = vcmask 490496  }
  0xc1   :  { %129 = vst.msk [vmem:[#allocation2 + $0xc] sm:$0x3] %vm3911_vm7, %v118_v17 }
  0xc2   :  { %96 = vst.msk [vmem:[#allocation2 + $0x18] sm:$0x3] %vm3912_vm9, %v86_v18  ;;  %vm3914_vm9 = vcmask 1025904  }
  0xc3   :  { %vm3915_vm12 = vmmov %vm3914_vm9 }
  0xc4   :  { %v103_v19 = vpop.permute.xlu1 %102  ;;  %v309_v20 = vpop.permute.xlu0 %308 }
  0xc5   :  { %113 = vst.msk [vmem:[#allocation2 + $0x18] sm:$0x3] %vm110_vm13, %v103_v19  ;;  %v314_v22 = vrot.slane %v309_v20, 4 }
  0xc6   :  { %v2953_v23 = vld [vmem:[#allocation2 + $0x14] sm:$0xf] }
  0xc7   :  { %v319_v24 = vsel %vm3913_vm10, %v309_v20, %v314_v22  ;;  %514 = vrot.lane.b32.xlu1 %v2953_v23, %s2723_s29  ;;  %vm3923_vm10 = vcmask 583104  }
  0xc8   :  { %330 = vst.msk [vmem:[#allocation2 + $0x1c] sm:$0x33] %vm2879_vm15, %v319_v24  ;;  %v120_v25 = vpop.permute.xlu1 %119  ;;  %v135_v26 = vpop.permute.xlu0 %134 }
  0xc9   :  { %130 = vst.msk [vmem:[#allocation2 + $0x18] sm:$0x3] %vm3911_vm7, %v120_v25  ;;  %vm3924_vm7 = vcmask 506880  }
  0xca   :  { %146 = vst.msk [vmem:[#allocation2 + $0xc] sm:$0x3] %vm3914_vm9, %v135_v26  ;;  %vm3925_vm9 = vcmask 878304  }
  0xcb   :  { %534 = vrot.lane.b32.xlu1 %v2953_v23, %s2735_s24 }
  0xcc   :  { %v137_v27 = vpop.permute.xlu1 %136  ;;  %v337_v28 = vpop.permute.xlu0 %336 }
  0xcd   :  { %147 = vst.msk [vmem:[#allocation2 + $0x18] sm:$0x3] %vm3915_vm12, %v137_v27  ;;  %v342_v29 = vrot.slane %v337_v28, 4 }
  0xcf   :  { %351 = vst.msk [vmem:[#allocation2 + $0x20] sm:$0x3] %vm348_vm8, %v342_v29 }
  0xd0   :  { %v358_v31 = vpop.permute.xlu0 %357  ;;  %v379_v32 = vpop.permute.xlu1 %378 }
  0xd1   :  { %v2965_v30 = vld [vmem:[#allocation2 + $0xc] sm:$0xff]  ;;  %v363_v33 = vrot.slane %v358_v31, 4  ;;  %v384_v34 = vrot.slane %v379_v32, 4 }
  0xd2   :  { %512 = vrot.lane.b32.xlu0 %v2965_v30, %s2723_s29  ;;  %s2737_s29 = smov 8  }
  0xd3   :  { %372 = vst.msk [vmem:[#allocation2 + $0x20] sm:$0x3] %vm369_vm11, %v363_v33 }
  0xd4   :  { %v2970_v35 = vld [vmem:[#allocation2 + $0x18] sm:$0xff]  ;;  %393 = vst.msk [vmem:[#allocation2 + $0x20] sm:$0x3] %vm3916_vm14, %v384_v34  ;;  %v207_v36 = vpop.permute.xlu1 %206  ;;  %v156_v37 = vpop.permute.xlu0 %155 }
  0xd5   :  { %664 = vrot.lane.b32.xlu1 %v2970_v35, %s2736_s25  ;;  %165 = vst.msk [vmem:[#allocation2 + $0x28] sm:$0x3] %vm161_vm1, %v156_v37  ;;  %v211_v38 = vrot.slane %v207_v36, 4  ;;  %vm3917_vm1 = vcmask 474112  }
  0xd6   :  { %532 = vrot.lane.b32.xlu0 %v2965_v30, %s2735_s24 }
  0xd7   :  { %v216_v43 = vsel %vm212_vm4, %v207_v36, %v211_v38  ;;  %vm3919_vm4 = vcmask 861904  }
  0xd8   :  { %v233_v39 = vpop.permute.xlu1 %232  ;;  %v173_v40 = vpop.permute.xlu0 %172 }
  0xd9   :  { %548 = vrot.lane.b32.xlu1 %v2953_v23, %s2721_s27  ;;  %v237_v41 = vrot.slane %v233_v39, 4  ;;  %182 = vst.msk [vmem:[#allocation2 + $0x28] sm:$0x3] %vm178_vm2, %v173_v40  ;;  %vm3918_vm2 = vcmask 714304  }
  0xda   :  { %649 = vrot.lane.b32.xlu0 %v2970_v35, %s2737_s29 }
  0xdb   :  { %v242_v44 = vsel %vm238_vm3, %v233_v39, %v237_v41  ;;  %v2989_v48 = vld [vmem:[#allocation2 + $0x20] sm:$0xf] }
  0xdc   :  { %v259_v45 = vpop.permute.xlu1 %258  ;;  %v190_v46 = vpop.permute.xlu0 %189 }
  0xdd   :  { %562 = vrot.lane.b32.xlu1 %v2953_v23, %s2710_s17  ;;  %v263_v47 = vrot.slane %v259_v45, 4  ;;  %199 = vst.msk [vmem:[#allocation2 + $0x28] sm:$0x3] %vm195_vm5, %v190_v46  ;;  %vm3920_vm5 = vcmask 435504  }
  0xde   :  { %546 = vrot.lane.b32.xlu0 %v2965_v30, %s2721_s27  ;;  %225 = vst.msk [vmem:[#allocation2 + $0x28] sm:$0x3] %vm221_vm6, %v216_v43  ;;  %vm3922_vm6 = vcmask 1009504   ;;  %s2739_s27 = smov 49  }
  0xdf   :  { %v268_v49 = vsel %vm3917_vm1, %v259_v45, %v263_v47  ;;  %251 = vst.msk [vmem:[#allocation2 + $0x28] sm:$0x3] %vm3918_vm2, %v242_v44  ;;  %vm423_vm1 = vcmask 1031168  }
  0xe0   :  { %277 = vst.msk [vmem:[#allocation2 + $0x28] sm:$0x3] %vm3919_vm4, %v268_v49  ;;  %v285_v50 = vpop.permute.xlu1 %284  ;;  %v71_v51 = vpop.permute.xlu0 %70  ;;  %vm436_vm4 = vcmask 900096  }
  0xe1   :  { %690 = vrot.lane.b32.xlu1 %v2989_v48, %s2738_s30  ;;  %v289_v52 = vrot.slane %v285_v50, 4  ;;  %80 = vst.msk [vmem:[#allocation2 + $0x24] sm:$0x3] %vm3920_vm5, %v71_v51 }
  0xe2   :  { %560 = vrot.lane.b32.xlu0 %v2965_v30, %s2710_s17  ;;  %s2740_s17 = smov 6  }
  0xe3   :  { %v294_v53 = vsel %vm3921_vm0, %v285_v50, %v289_v52  ;;  %vm449_vm0 = vcmask 891904  }
  0xe4   :  { %303 = vst.msk [vmem:[#allocation2 + $0x28] sm:$0x3] %vm3922_vm6, %v294_v53  ;;  %v311_v54 = vpop.permute.xlu1 %310  ;;  %v88_v55 = vpop.permute.xlu0 %87 }
  0xe5   :  { %574 = vrot.lane.b32.xlu1 %v2965_v30, %s2739_s27  ;;  %v315_v56 = vrot.slane %v311_v54, 4  ;;  %97 = vst.msk [vmem:[#allocation2 + $0x24] sm:$0x3] %vm3923_vm10, %v88_v55  ;;  %vm462_vm10 = vcmask 883712  }
  0xe6   :  { %688 = vrot.lane.b32.xlu0 %v2970_v35, %s2738_s30 }
  0xe7   :  { %v320_v57 = vsel %vm3924_vm7, %v311_v54, %v315_v56 }
  0xe8   :  { %331 = vst.msk [vmem:[#allocation2 + $0x28] sm:$0x33] %vm2879_vm15, %v320_v57  ;;  %v122_v58 = vpop.permute.xlu1 %121  ;;  %v105_v59 = vpop.permute.xlu0 %104  ;;  %vm3926_vm15 = vmmov %vm3915_vm12  ;;  %vm410_vm12 = vcmask 1039360  }
  0xe9   :  { %588 = vrot.lane.b32.xlu1 %v2965_v30, %s2711_s18  ;;  %114 = vst.msk [vmem:[#allocation2 + $0x24] sm:$0x3] %vm110_vm13, %v105_v59  ;;  %vm3927_vm13 = vmmov %vm3916_vm14 }
  0xea   :  { %676 = vrot.lane.b32.xlu0 %v2970_v35, %s2740_s17  ;;  %131 = vst.msk [vmem:[#allocation2 + $0x24] sm:$0x3] %vm3925_vm9, %v122_v58  ;;  %vm475_vm9 = vcmask 752640  }
  0xec   :  { %v339_v60 = vpop.permute.xlu1 %338  ;;  %v139_v61 = vpop.permute.xlu0 %138 }
  0xed   :  { %701 = vrot.lane.b32.xlu1 %v2970_v35, %s2741_s5  ;;  %v343_v21 = vrot.slane %v339_v60, 4  ;;  %148 = vst.msk [vmem:[#allocation2 + $0x24] sm:$0x3] %vm3926_vm15, %v139_v61 }
  0xee   :  { %576 = vrot.lane.b32.xlu0 %v2953_v23, %s2739_s27 }
  0xef   :  { %352 = vst.msk [vmem:[#allocation2 + $0x2c] sm:$0x3] %vm348_vm8, %v343_v21  ;;  %vm3928_vm8 = vcmask 551936  }
  0xf0   :  { %v381_v62 = vpop.permute.xlu1 %380  ;;  %v360_v63 = vpop.permute.xlu0 %359  ;;  %vm3929_vm14 = vmmov %vm3928_vm8 }
  0xf1   :  { %714 = vrot.lane.b32.xlu1 %v2970_v35, %s2742_s6  ;;  %v385_v0 = vrot.slane %v381_v62, 4  ;;  %v364_v2 = vrot.slane %v360_v63, 4  ;;  %vm3930_vm2 = vmmov %vm3928_vm8 }
  0xf2   :  { %590 = vrot.lane.b32.xlu0 %v2953_v23, %s2711_s18  ;;  %s2746_s18 = smov 99   ;;  %vm3931_vm5 = vmmov %vm3930_vm2 }
  0xf3   :  { %373 = vst.msk [vmem:[#allocation2 + $0x2c] sm:$0x3] %vm369_vm11, %v364_v2  ;;  %vm408_vm11 = vcmask 1043456   ;;  %vm3932_vm6 = vmmov %vm3930_vm2 }
  0xf4   :  { %394 = vst.msk [vmem:[#allocation2 + $0x2c] sm:$0x3] %vm3927_vm13, %v385_v0  ;;  %v3035_v4 = vld [vmem:[#allocation2 + $0x24] sm:$0xff]  ;;  %vm3933_vm7 = vmmov %vm3930_vm2  ;;  %vm488_vm13 = vcmask 744448   ;;  %v3088_v0 = vld [vmem:[%s3882_s1] sm:$0xf] }
  0xf5   :  { %602 = vrot.lane.b32.xlu1 %v2965_v30, %s2743_s7  ;;  %vm3934_vm15 = vmmov %vm3930_vm2 }
  0xf6   :  { %703 = vrot.lane.b32.xlu0 %v2989_v48, %s2741_s5 }
  0xf9   :  { %616 = vrot.lane.b32.xlu1 %v2965_v30, %s2744_s8 }
  0xfa   :  { %716 = vrot.lane.b32.xlu0 %v2989_v48, %s2742_s6 }
  0xfb   :  { %v768_v37 = vld [vmem:[#allocation2 + $0x2c] sm:$0xf] }
  0xfd   :  { %727 = vrot.lane.b32.xlu1 %v2970_v35, %s2745_s9 }
  0xfe   :  { %604 = vrot.lane.b32.xlu0 %v2953_v23, %s2743_s7 }
 0x101   :  { %740 = vrot.lane.b32.xlu1 %v2970_v35, %s2746_s18 }
 0x102   :  { %618 = vrot.lane.b32.xlu0 %v2953_v23, %s2744_s8 }
 0x105   :  { %630 = vrot.lane.b32.xlu1 %v2965_v30, %s2747_s10 }
 0x106   :  { %729 = vrot.lane.b32.xlu0 %v2989_v48, %s2745_s9 }
 0x109   :  { %753 = vrot.lane.b32.xlu1 %v2970_v35, %s2748_s11  ;;  %v405_v3 = vpop.permute.xlu1 %404 }
 0x10a   :  { %742 = vrot.lane.b32.xlu0 %v2989_v48, %s2746_s18  ;;  %415 = vst.msk [vmem:[#allocation3 + $0x34] sm:$0xf] %vm3928_vm8, %v405_v3  ;;  %v407_v5 = vrot.slane %v405_v3, 4  ;;  %vm3935_vm8 = vmmov %vm3930_vm2 }
 0x10c   :  { %v403_v6 = vpop.permute.xlu0 %402 }
 0x10d   :  { %v406_v7 = vrot.slane %v403_v6, 4  ;;  %771 = vrot.lane.b32.xlu1 %v3035_v4, %s2749_s12  ;;  %v419_v8 = vpop.permute.xlu1 %418 }
 0x10e   :  { %632 = vrot.lane.b32.xlu0 %v2953_v23, %s2747_s10  ;;  %428 = vst.msk [vmem:[#allocation3 + $0x60] sm:$0xf] %vm3929_vm14, %v419_v8  ;;  %v421_v12 = vrot.slane %v419_v8, 4  ;;  %vm1212_vm14 = vcmask 588800  }
 0x10f   :  { %v409_v9 = vsel %vm408_vm11, %v406_v7, %v407_v5 }
 0x110   :  { %v411_v10 = vsel %vm410_vm12, %v403_v6, %v409_v9  ;;  %v417_v11 = vpop.permute.xlu0 %416  ;;  %vm501_vm12 = vcmask 736256  }
 0x111   :  { %v420_v13 = vrot.slane %v417_v11, 4  ;;  %651 = vrot.lane.b32.xlu1 %v2989_v48, %s2737_s29  ;;  %v432_v14 = vpop.permute.xlu1 %431  ;;  %v2144_v15 = vcombine.high %v2903_v42, %v411_v10  ;;  %v2143_v16 = vcombine.low %v2903_v42, %v411_v10 }
 0x112   :  { %755 = vrot.lane.b32.xlu0 %v2989_v48, %s2748_s11  ;;  %441 = vst.msk [vmem:[#allocation3 + $0x8c] sm:$0xf] %vm3930_vm2, %v432_v14  ;;  %v434_v20 = vrot.slane %v432_v14, 4  ;;  %vm525_vm2 = vcmask 1047556  }
 0x113   :  { %v422_v17 = vsel %vm408_vm11, %v420_v13, %v421_v12  ;;  %1249 = vmatprep.subr.bf16.mxu1 %v2144_v15 }
 0x114   :  { %v424_v18 = vsel %vm423_vm1, %v417_v11, %v422_v17  ;;  %v430_v19 = vpop.permute.xlu0 %429  ;;  %1250 = vmatpush1.bf16.msra.mxu1 %v2143_v16  ;;  %vm524_vm1 = vcmask 1044000   ;;  %v954_v17 = vld [vmem:[%s3883_s2] sm:$0xff] }
 0x115   :  { %v433_v22 = vrot.slane %v430_v19, 4  ;;  %803 = vrot.lane.b32.xlu1 %v3035_v4, %s2750_s0  ;;  %v445_v23 = vpop.permute.xlu1 %444 }
 0x116   :  { %789 = vrot.lane.b32.xlu0 %v3035_v4, %s2751_s13  ;;  %454 = vst.msk [vmem:[#allocation3 + $0xb8] sm:$0xf] %vm3931_vm5, %v445_v23  ;;  %v447_v26 = vrot.slane %v445_v23, 4  ;;  %vm518_vm5 = vcmask 556032  }
 0x117   :  { %v435_v42 = vsel %vm408_vm11, %v433_v22, %v434_v20 }
 0x118   :  { %v437_v24 = vsel %vm436_vm4, %v430_v19, %v435_v42  ;;  %v443_v25 = vpop.permute.xlu0 %442  ;;  %vm529_vm4 = vcmask 64516  }
 0x119   :  { %v446_v27 = vrot.slane %v443_v25, 4  ;;  %678 = vrot.lane.b32.xlu1 %v2989_v48, %s2740_s17  ;;  %v458_v28 = vpop.permute.xlu1 %457  ;;  %v2155_v29 = vcombine.high %v424_v18, %v437_v24  ;;  %v2154_v30 = vcombine.low %v424_v18, %v437_v24 }
 0x11a   :  { %666 = vrot.lane.b32.xlu0 %v2989_v48, %s2736_s25  ;;  %467 = vst.msk [vmem:[#allocation3 + $0xe4] sm:$0xf] %vm3932_vm6, %v458_v28  ;;  %v460_v34 = vrot.slane %v458_v28, 4  ;;  %vm3105_vm6 = vmor %vm529_vm4, %vm408_vm11  ;;  %vm580_vm4 = vcmask 400384  }
 0x11b   :  { %v448_v31 = vsel %vm408_vm11, %v446_v27, %v447_v26  ;;  %1251 = vmatprep.subr.bf16.mxu1 %v2155_v29 }
 0x11c   :  { %v450_v32 = vsel %vm449_vm0, %v443_v25, %v448_v31  ;;  %v456_v33 = vpop.permute.xlu0 %455  ;;  %1252 = vmatpush1.bf16.msra.mxu1 %v2154_v30  ;;  %vm3100_vm0 = vmor %vm525_vm2, %vm524_vm1  ;;  %vm566_vm1 = vcmask 408576  }
 0x11d   :  { %v459_v35 = vrot.slane %v456_v33, 4  ;;  %844 = vrot.lane.b32.xlu1 %v3035_v4, %s2713_s19  ;;  %v471_v36 = vpop.permute.xlu1 %470 }
 0x11e   :  { %817 = vrot.lane.b32.xlu0 %v3035_v4, %s2715_s21  ;;  %480 = vst.msk [vmem:[#allocation3 + $0x110] sm:$0xf] %vm3933_vm7, %v471_v36  ;;  %v473_v41 = vrot.slane %v471_v36, 4  ;;  %vm659_vm7 = vcmask 1043520  }
 0x11f   :  { %v461_v38 = vsel %vm408_vm11, %v459_v35, %v460_v34 }
 0x120   :  { %v463_v39 = vsel %vm462_vm10, %v456_v33, %v461_v38  ;;  %v469_v40 = vpop.permute.xlu0 %468  ;;  %vm538_vm10 = vcmask 547840  }
 0x121   :  { %v472_v43 = vrot.slane %v469_v40, 4  ;;  %791 = vrot.lane.b32.xlu1 %v768_v37, %s2751_s13  ;;  %v484_v44 = vpop.permute.xlu1 %483  ;;  %v2166_v45 = vcombine.high %v450_v32, %v463_v39  ;;  %v2165_v46 = vcombine.low %v450_v32, %v463_v39 }
 0x122   :  { %830 = vrot.lane.b32.xlu0 %v3035_v4, %s2752_s14  ;;  %493 = vst.msk [vmem:[#allocation3 + $0x13c] sm:$0xf] %vm3934_vm15, %v484_v44  ;;  %v486_v50 = vrot.slane %v484_v44, 4  ;;  %vm3121_vm15 = vmor %vm525_vm2, %vm659_vm7  ;;  %vm681_vm7 = vcmask 48128  }
 0x123   :  { %v474_v47 = vsel %vm408_vm11, %v472_v43, %v473_v41  ;;  %1253 = vmatprep.subr.bf16.mxu1 %v2166_v45 }
 0x124   :  { %v476_v48 = vsel %vm475_vm9, %v469_v40, %v474_v47  ;;  %v482_v49 = vpop.permute.xlu0 %481  ;;  %1254 = vmatpush1.bf16.msra.mxu1 %v2165_v46  ;;  %vm669_vm9 = vcmask 56320  }
 0x125   :  { %v485_v51 = vrot.slane %v482_v49, 4  ;;  %871 = vrot.lane.b32.xlu1 %v3035_v4, %s2753_s15  ;;  %v497_v52 = vpop.permute.xlu1 %496 }
 0x126   :  { %773 = vrot.lane.b32.xlu0 %v768_v37, %s2749_s12  ;;  %506 = vst.msk [vmem:[#allocation3 + $0x168] sm:$0xf] %vm3935_vm8, %v497_v52  ;;  %v499_v56 = vrot.slane %v497_v52, 4  ;;  %vm552_vm8 = vcmask 539648  }
 0x127   :  { %v487_v53 = vsel %vm408_vm11, %v485_v51, %v486_v50 }
 0x128   :  { %v489_v54 = vsel %vm488_vm13, %v482_v49, %v487_v53  ;;  %v495_v55 = vpop.permute.xlu0 %494  ;;  %vm654_vm13 = vcmask 64512  }
 0x129   :  { %v498_v57 = vrot.slane %v495_v55, 4  ;;  %819 = vrot.lane.b32.xlu1 %v768_v37, %s2715_s21  ;;  %v2177_v58 = vcombine.high %v476_v48, %v489_v54  ;;  %v2176_v59 = vcombine.low %v476_v48, %v489_v54 }
 0x12a   :  { %857 = vrot.lane.b32.xlu0 %v3035_v4, %s2722_s28 }
 0x12b   :  { %v500_v60 = vsel %vm408_vm11, %v498_v57, %v499_v56  ;;  %1255 = vmatprep.subr.bf16.mxu1 %v2177_v58 }
 0x12c   :  { %v502_v61 = vsel %vm501_vm12, %v495_v55, %v500_v60  ;;  %1256 = vmatpush1.bf16.msra.mxu1 %v2176_v59  ;;  %vm662_vm12 = vcmask 617472  }
 0x12d   :  { %832 = vrot.lane.b32.xlu1 %v768_v37, %s2752_s14  ;;  %v2188_v21 = vcombine.high %v502_v61, %v502_v61  ;;  %v2187_v62 = vcombine.low %v502_v61, %v502_v61 }
 0x12e   :  { %805 = vrot.lane.b32.xlu0 %v768_v37, %s2750_s0 }
 0x12f   :  { %2198 = vmatprep.subr.msk.bf16.mxu1 %vm408_vm11, %v2188_v21  ;;  %v1217_v63 = vsel %vm408_vm11, %v2187_v62, 0 }
 0x130   :  { %1258 = vmatpush1.bf16.msra.mxu1 %v1217_v63 }
 0x131   :  { %859 = vrot.lane.b32.xlu1 %v768_v37, %s2722_s28 }
 0x132   :  { %885 = vrot.lane.b32.xlu0 %v3035_v4, %s2720_s26 }
 0x133   :  { %2199 = vmatmul.mubr.msk.bf16.vlgmr.msra.gmra.mrb[0].mxu1 %vm1212_vm14, %v3088_v0 }
 0x134   :  { %1322 = vmatprep.mubr.bf16.mxu1 %v2712_v1 }
 0x135   :  { %887 = vrot.lane.b32.xlu1 %v768_v37, %s2720_s26 }
 0x136   :  { %846 = vrot.lane.b32.xlu0 %v768_v37, %s2713_s19 }
 0x139   :  { %v515_v2 = vpop.permute.xlu1 %514 }
 0x13a   :  { %873 = vrot.lane.b32.xlu0 %v768_v37, %s2753_s15  ;;  %v517_v6 = vrot.slane %v515_v2, 4 }
 0x13d   :  { %v535_v3 = vpop.permute.xlu1 %534 }
 0x13e   :  { %v537_v14 = vrot.slane %v535_v3, 4  ;;  %957 = vperm.xlu0 %2626, %v954_v17  }
 0x144   :  { %v513_v5 = vpop.permute.xlu0 %512 }
 0x145   :  { %v516_v7 = vrot.slane %v513_v5, 4 }
 0x147   :  { %v519_v9 = vsel %vm518_vm5, %v516_v7, %v513_v5  ;;  %v520_v10 = vsel %vm408_vm11, %v516_v7, %v517_v6  ;;  %v3112_v12 = vpop.permute.xlu1 %664 }
 0x148   :  { %v521_v11 = vsel %vm518_vm5, %v520_v10, %v515_v2  ;;  %527 = vst.msk [vmem:[#allocation3 + $0x8] sm:$0xff] %vm3100_vm0, %v519_v9  ;;  %v533_v13 = vpop.permute.xlu0 %532  ;;  %v668_v15 = vrot.slane %v3112_v12, 4  ;;  %vm695_vm5 = vcmask 965632  }
 0x149   :  { %v536_v16 = vrot.slane %v533_v13, 4  ;;  %531 = vst.msk [vmem:[#allocation3 + $0x10] sm:$0xff] %vm3105_vm6, %v521_v11 }
 0x14a   :  { %v670_v24 = vsel %vm669_vm9, %v668_v15, %v3112_v12 }
 0x14b   :  { %v539_v19 = vsel %vm538_vm10, %v536_v16, %v533_v13  ;;  %v540_v20 = vsel %vm408_vm11, %v536_v16, %v537_v14  ;;  %v549_v23 = vpop.permute.xlu1 %548 }
 0x14c   :  { %v541_v22 = vsel %vm538_vm10, %v540_v20, %v535_v3  ;;  %544 = vst.msk [vmem:[#allocation3 + $0x34] sm:$0xff] %vm3100_vm0, %v539_v19  ;;  %v3128_v42 = vpop.permute.xlu0 %649  ;;  %v551_v29 = vrot.slane %v549_v23, 4  ;;  %vm594_vm10 = vcmask 392192  }
 0x14d   :  { %545 = vst.msk [vmem:[#allocation3 + $0x3c] sm:$0xff] %vm3105_vm6, %v541_v22  ;;  %v653_v25 = vrot.slane %v3128_v42, 4 }
 0x14e   :  { %674 = vst.msk [vmem:[#allocation3 + $0x40] sm:$0xff] %vm3121_vm15, %v670_v24 }
 0x14f   :  { %v655_v26 = vsel %vm654_vm13, %v653_v25, %v3128_v42  ;;  %v563_v27 = vpop.permute.xlu1 %562 }
 0x150   :  { %661 = vst.msk [vmem:[#allocation3 + $0x14] sm:$0xff] %vm3121_vm15, %v655_v26  ;;  %v547_v28 = vpop.permute.xlu0 %546  ;;  %v565_v38 = vrot.slane %v563_v27, 4 }
 0x151   :  { %v550_v30 = vrot.slane %v547_v28, 4 }
 0x153   :  { %v553_v31 = vsel %vm552_vm8, %v550_v30, %v547_v28  ;;  %v554_v32 = vsel %vm408_vm11, %v550_v30, %v551_v29  ;;  %v2627_v33 = vld [vmem:[#allocation3 + $0x8] ss:$44 sps:$4 sm:$0xff]   ;;  %v2629_v34 = vld [vmem:[#allocation3 + $0xc] ss:$44 sps:$4 sm:$0xff]   ;;  %v691_v36 = vpop.permute.xlu1 %690 }
 0x154   :  { %v555_v35 = vsel %vm552_vm8, %v554_v32, %v549_v23  ;;  %558 = vst.msk [vmem:[#allocation3 + $0x60] sm:$0xff] %vm3100_vm0, %v553_v31  ;;  %v561_v37 = vpop.permute.xlu0 %560  ;;  %1290 = vmatprep.subr.bf16.mxu1 %v2629_v34  ;;  %v693_v40 = vrot.slane %v691_v36, 4  ;;  %v2632_v45 = vld [vmem:[#allocation3 + $0x10] ss:$44 sps:$4 sm:$0xff]   ;;  %vm608_vm8 = vcmask 261120  }
 0x155   :  { %559 = vst.msk [vmem:[#allocation3 + $0x68] sm:$0xff] %vm3105_vm6, %v555_v35  ;;  %v564_v39 = vrot.slane %v561_v37, 4  ;;  %1291 = vmatpush1.bf16.msra.mxu1 %v2627_v33 }
 0x156   :  { %700 = vst.msk [vmem:[#allocation3 + $0xa0] sm:$0xf] %vm662_vm12, %v691_v36 }
 0x157   :  { %v567_v41 = vsel %vm566_vm1, %v564_v39, %v561_v37  ;;  %v568_v43 = vsel %vm408_vm11, %v564_v39, %v565_v38  ;;  %v2630_v44 = vld [vmem:[#allocation3 + $0x14] ss:$44 sps:$4 sm:$0xff]   ;;  %v575_v47 = vpop.permute.xlu1 %574 }
 0x158   :  { %v569_v46 = vsel %vm566_vm1, %v568_v43, %v563_v27  ;;  %572 = vst.msk [vmem:[#allocation3 + $0x8c] sm:$0xff] %vm3100_vm0, %v567_v41  ;;  %v689_v48 = vpop.permute.xlu0 %688  ;;  %v578_v49 = vrot.slane %v575_v47, 4  ;;  %1331 = vmatprep.subr.bf16.mxu0 %v2630_v44  ;;  %vm708_vm1 = vcmask 957440  }
 0x159   :  { %573 = vst.msk [vmem:[#allocation3 + $0x94] sm:$0xff] %vm3105_vm6, %v569_v46  ;;  %v692_v50 = vrot.slane %v689_v48, 4  ;;  %1332 = vmatpush1.bf16.msra.mxu0 %v2632_v45 }
 0x15a   :  { %v581_v51 = vsel %vm580_vm4, %v578_v49, %v575_v47 }
 0x15b   :  { %v694_v52 = vsel %vm408_vm11, %v692_v50, %v693_v40  ;;  %586 = vst.msk [vmem:[#allocation3 + $0xb8] sm:$0xff] %vm3100_vm0, %v581_v51  ;;  %v589_v54 = vpop.permute.xlu1 %588 }
 0x15c   :  { %v696_v53 = vsel %vm695_vm5, %v689_v48, %v694_v52  ;;  %v3160_v55 = vpop.permute.xlu0 %676  ;;  %v592_v56 = vrot.slane %v589_v54, 4  ;;  %vm721_vm5 = vcmask 949248  }
 0x15d   :  { %699 = vst.msk [vmem:[#allocation3 + $0x98] sm:$0xff] %vm3121_vm15, %v696_v53  ;;  %v680_v57 = vrot.slane %v3160_v55, 4 }
 0x15e   :  { %v595_v58 = vsel %vm594_vm10, %v592_v56, %v589_v54 }
 0x15f   :  { %v682_v59 = vsel %vm681_vm7, %v680_v57, %v3160_v55  ;;  %v2633_v60 = vld [vmem:[#allocation3 + $0x60] ss:$44 sps:$4 sm:$0xff]   ;;  %v2635_v61 = vld [vmem:[#allocation3 + $0x64] ss:$44 sps:$4 sm:$0xff]   ;;  %600 = vst.msk [vmem:[#allocation3 + $0xe4] sm:$0xff] %vm3100_vm0, %v595_v58  ;;  %v702_v21 = vpop.permute.xlu1 %701 }
 0x160   :  { %686 = vst.msk [vmem:[#allocation3 + $0x6c] sm:$0xff] %vm3121_vm15, %v682_v59  ;;  %v577_v62 = vpop.permute.xlu0 %576  ;;  %1292 = vmatprep.subr.bf16.mxu1 %v2635_v61  ;;  %v2641_v19 = vld [vmem:[#allocation3 + $0x68] ss:$44 sps:$4 sm:$0xff]   ;;  %v705_v20 = vrot.slane %v702_v21, 4 }
 0x161   :  { %v579_v63 = vrot.slane %v577_v62, 4  ;;  %1293 = vmatpush1.bf16.msra.mxu1 %v2633_v60 }
 0x163   :  { %v582_v2 = vsel %vm408_vm11, %v578_v49, %v579_v63  ;;  %v715_v5 = vpop.permute.xlu1 %714 }
 0x164   :  { %v583_v3 = vsel %vm580_vm4, %v582_v2, %v577_v62  ;;  %v591_v6 = vpop.permute.xlu0 %590  ;;  %vm622_vm4 = vcmask 252928   ;;  %v718_v30 = vrot.slane %v715_v5, 4 }
 0x165   :  { %587 = vst.msk [vmem:[#allocation3 + $0xc0] sm:$0xff] %vm3105_vm6, %v583_v3  ;;  %v593_v7 = vrot.slane %v591_v6, 4 }
 0x166   :  { %v2636_v10 = vld [vmem:[#allocation3 + $0xb8] ss:$44 sps:$4 sm:$0xff]   ;;  %v2638_v11 = vld [vmem:[#allocation3 + $0xbc] ss:$44 sps:$4 sm:$0xff]  }
 0x167   :  { %v596_v9 = vsel %vm408_vm11, %v592_v56, %v593_v7  ;;  %v603_v14 = vpop.permute.xlu1 %602  ;;  %v2639_v17 = vld [vmem:[#allocation3 + $0x6c] ss:$44 sps:$4 sm:$0xff]   ;;  %1294 = vmatprep.subr.bf16.mxu1 %v2638_v11 }
 0x168   :  { %v597_v13 = vsel %vm594_vm10, %v596_v9, %v591_v6  ;;  %v704_v16 = vpop.permute.xlu0 %703  ;;  %v606_v22 = vrot.slane %v603_v14, 4  ;;  %1333 = vmatprep.subr.bf16.mxu0 %v2639_v17  ;;  %1295 = vmatpush1.bf16.msra.mxu1 %v2636_v10  ;;  %vm636_vm10 = vcmask 244736  }
 0x169   :  { %601 = vst.msk [vmem:[#allocation3 + $0xec] sm:$0xff] %vm3105_vm6, %v597_v13  ;;  %v706_v23 = vrot.slane %v704_v16, 4  ;;  %1334 = vmatpush1.bf16.msra.mxu0 %v2641_v19 }
 0x16a   :  { %713 = vst.msk [vmem:[#allocation3 + $0xcc] sm:$0xf] %vm662_vm12, %v704_v16  ;;  %v609_v24 = vsel %vm608_vm8, %v606_v22, %v603_v14 }
 0x16b   :  { %v707_v26 = vsel %vm408_vm11, %v705_v20, %v706_v23  ;;  %614 = vst.msk [vmem:[#allocation3 + $0x110] sm:$0xff] %vm3100_vm0, %v609_v24  ;;  %v617_v28 = vpop.permute.xlu1 %616 }
 0x16c   :  { %v709_v27 = vsel %vm708_vm1, %v702_v21, %v707_v26  ;;  %v717_v29 = vpop.permute.xlu0 %716  ;;  %v620_v31 = vrot.slane %v617_v28, 4  ;;  %vm747_vm1 = vcmask 809984  }
 0x16d   :  { %712 = vst.msk [vmem:[#allocation3 + $0xc4] sm:$0xff] %vm3121_vm15, %v709_v27  ;;  %v719_v32 = vrot.slane %v717_v29, 4 }
 0x16e   :  { %726 = vst.msk [vmem:[#allocation3 + $0xf8] sm:$0xf] %vm662_vm12, %v717_v29  ;;  %v623_v33 = vsel %vm622_vm4, %v620_v31, %v617_v28 }
 0x16f   :  { %v720_v34 = vsel %vm408_vm11, %v718_v30, %v719_v32  ;;  %628 = vst.msk [vmem:[#allocation3 + $0x13c] sm:$0xff] %vm3100_vm0, %v623_v33  ;;  %v728_v36 = vpop.permute.xlu1 %727 }
 0x170   :  { %v722_v35 = vsel %vm721_vm5, %v715_v5, %v720_v34  ;;  %v605_v37 = vpop.permute.xlu0 %604  ;;  %v2647_v52 = vld [vmem:[#allocation3 + $0xc0] ss:$44 sps:$4 sm:$0xff]   ;;  %v731_v53 = vrot.slane %v728_v36, 4 }
 0x171   :  { %725 = vst.msk [vmem:[#allocation3 + $0xf0] sm:$0xff] %vm3121_vm15, %v722_v35  ;;  %v607_v38 = vrot.slane %v605_v37, 4 }
 0x173   :  { %v610_v39 = vsel %vm408_vm11, %v606_v22, %v607_v38  ;;  %v741_v41 = vpop.permute.xlu1 %740 }
 0x174   :  { %v611_v40 = vsel %vm608_vm8, %v610_v39, %v605_v37  ;;  %v619_v43 = vpop.permute.xlu0 %618  ;;  %vm734_vm8 = vcmask 818176   ;;  %v744_v62 = vrot.slane %v741_v41, 4 }
 0x175   :  { %615 = vst.msk [vmem:[#allocation3 + $0x118] sm:$0xff] %vm3105_vm6, %v611_v40  ;;  %v621_v44 = vrot.slane %v619_v43, 4 }
 0x176   :  { %v2642_v46 = vld [vmem:[#allocation3 + $0x110] ss:$44 sps:$4 sm:$0xff]   ;;  %v2644_v47 = vld [vmem:[#allocation3 + $0x114] ss:$44 sps:$4 sm:$0xff]  }
 0x177   :  { %v624_v45 = vsel %vm408_vm11, %v620_v31, %v621_v44  ;;  %v631_v49 = vpop.permute.xlu1 %630  ;;  %1296 = vmatprep.subr.bf16.mxu1 %v2644_v47 }
 0x178   :  { %v625_v48 = vsel %vm622_vm4, %v624_v45, %v619_v43  ;;  %v730_v50 = vpop.permute.xlu0 %729  ;;  %v2645_v51 = vld [vmem:[#allocation3 + $0xc4] ss:$44 sps:$4 sm:$0xff]   ;;  %v634_v54 = vrot.slane %v631_v49, 4  ;;  %1297 = vmatpush1.bf16.msra.mxu1 %v2642_v46  ;;  %vm783_vm4 = vcmask 1044064  }
 0x179   :  { %629 = vst.msk [vmem:[#allocation3 + $0x144] sm:$0xff] %vm3105_vm6, %v625_v48  ;;  %v732_v56 = vrot.slane %v730_v50, 4  ;;  %1335 = vmatprep.subr.bf16.mxu0 %v2645_v51  ;;  %vm3225_vm5 = vmor %vm525_vm2, %vm783_vm4  ;;  %vm809_vm2 = vcmask 605184   ;;  %v2653_v51 = vld [vmem:[#allocation3 + $0x18] ss:$44 sps:$4 sm:$0xff]   ;;  %v1521_v48 = vld [vmem:[%s3884_s3 + $0x80] sm:$0xff] }
 0x17a   :  { %739 = vst.msk [vmem:[#allocation3 + $0x124] sm:$0xf] %vm662_vm12, %v730_v50  ;;  %v637_v58 = vsel %vm636_vm10, %v634_v54, %v631_v49  ;;  %1336 = vmatpush1.bf16.msra.mxu0 %v2647_v52 }
 0x17b   :  { %v733_v59 = vsel %vm408_vm11, %v731_v53, %v732_v56  ;;  %642 = vst.msk [vmem:[#allocation3 + $0x168] sm:$0xff] %vm3100_vm0, %v637_v58  ;;  %v754_v61 = vpop.permute.xlu1 %753  ;;  %vm777_vm0 = vcmask 621568  }
 0x17c   :  { %v735_v60 = vsel %vm734_vm8, %v728_v36, %v733_v59  ;;  %v743_v21 = vpop.permute.xlu0 %742  ;;  %v757_v22 = vrot.slane %v754_v61, 4  ;;  %vm760_vm8 = vcmask 801792  }
 0x17d   :  { %738 = vst.msk [vmem:[#allocation3 + $0x11c] sm:$0xff] %vm3121_vm15, %v735_v60  ;;  %v745_v63 = vrot.slane %v743_v21, 4 }
 0x17e   :  { %752 = vst.msk [vmem:[#allocation3 + $0x150] sm:$0xf] %vm662_vm12, %v743_v21 }
 0x17f   :  { %v746_v2 = vsel %vm408_vm11, %v744_v62, %v745_v63  ;;  %v3213_v5 = vpop.permute.xlu1 %771  ;;  %v2656_v63 = vld [vmem:[#allocation3 + $0x70] ss:$44 sps:$4 sm:$0xff]  }
 0x180   :  { %v748_v3 = vsel %vm747_vm1, %v741_v41, %v746_v2  ;;  %v633_v6 = vpop.permute.xlu0 %632  ;;  %v775_v4 = vrot.slane %v3213_v5, 4 }
 0x181   :  { %751 = vst.msk [vmem:[#allocation3 + $0x148] sm:$0xff] %vm3121_vm15, %v748_v3  ;;  %v635_v7 = vrot.slane %v633_v6, 4 }
 0x182   :  { %v949_v10 = vld [vmem:[#allocation3 + $0x168] sm:$0xff]  ;;  %v778_v11 = vsel %vm777_vm0, %v775_v4, %v3213_v5 }
 0x183   :  { %v638_v9 = vsel %vm408_vm11, %v634_v54, %v635_v7  ;;  %v652_v16 = vpop.permute.xlu1 %651  ;;  %v2190_v19 = vcombine.high %v949_v10, %v949_v10  ;;  %v2189_v20 = vcombine.low %v949_v10, %v949_v10  ;;  %v2659_v10 = vld [vmem:[#allocation3 + $0xc8] ss:$44 sps:$4 sm:$0xff]  }
 0x184   :  { %v639_v13 = vsel %vm636_vm10, %v638_v9, %v633_v6  ;;  %v756_v17 = vpop.permute.xlu0 %755  ;;  %v656_v23 = vsel %vm654_vm13, %v653_v25, %v652_v16  ;;  %v938_v28 = vld [vmem:[#allocation3 + $0x118] sm:$0xff]  ;;  %vm836_vm13 = vcmask 465920   ;;  %vm863_vm10 = vcmask 326656  }
 0x185   :  { %643 = vst.msk [vmem:[#allocation3 + $0x170] sm:$0xff] %vm3105_vm6, %v639_v13  ;;  %v758_v24 = vrot.slane %v756_v17, 4  ;;  %2200 = vmatprep.subr.msk.bf16.mxu1 %vm408_vm11, %v2190_v19  ;;  %v1223_v26 = vsel %vm408_vm11, %v2189_v20, 0  ;;  %vm795_vm6 = vcmask 613376  }
 0x186   :  { %765 = vst.msk [vmem:[#allocation3 + $0x17c] sm:$0xf] %vm662_vm12, %v756_v17  ;;  %663 = vst.msk [vmem:[#allocation3 + $0x1c] sm:$0xf] %vm662_vm12, %v656_v23  ;;  %1299 = vmatpush1.bf16.msra.mxu1 %v1223_v26 }
 0x187   :  { %785 = vst.msk [vmem:[#allocation3 + $0x1c] sm:$0xff] %vm3225_vm5, %v778_v11  ;;  %v759_v8 = vsel %vm408_vm11, %v757_v22, %v758_v24  ;;  %v3241_v42 = vpop.permute.xlu1 %803 }
 0x188   :  { %v761_v27 = vsel %vm760_vm8, %v754_v61, %v759_v8  ;;  %v790_v25 = vpop.permute.xlu0 %789  ;;  %v944_v29 = vld [vmem:[#allocation3 + $0x144] sm:$0xff]  ;;  %v807_v32 = vrot.slane %v3241_v42, 4 }
 0x189   :  { %v2650_v30 = vld [vmem:[#allocation3 + $0x11c] ss:$44 sps:$4 sm:$0xff]   ;;  %764 = vst.msk [vmem:[#allocation3 + $0x174] sm:$0xff] %vm3121_vm15, %v761_v27  ;;  %v2180_v31 = vcombine.low %v938_v28, %v944_v29  ;;  %v793_v33 = vrot.slane %v790_v25, 4  ;;  %2201 = vmatmul.mubr.msk.bf16.vlgmr.msra.gmra.mrb[4].mxu1 %vm1212_vm14, %v3088_v0  ;;  %vm3944_vm15 = vcmask 474112  }
 0x18a   :  { %1337 = vmatprep.subr.bf16.mxu0 %v2650_v30  ;;  %1404 = vmatprep.mubr.bf16.mxu1 %v2712_v1  ;;  %v810_v37 = vsel %vm809_vm2, %v807_v32, %v3241_v42  ;;  %vm3947_vm1 = vmmov %vm3944_vm15 }
 0x18b   :  { %1338 = vmatpush1.bf16.msra.mxu0 %v2180_v31  ;;  %v679_v34 = vpop.permute.xlu1 %678  ;;  %v796_v38 = vsel %vm795_vm6, %v793_v33, %v790_v25 }
 0x18c   :  { %v667_v35 = vpop.permute.xlu0 %666  ;;  %v683_v18 = vsel %vm681_vm7, %v680_v57, %v679_v34  ;;  %vm877_vm7 = vcmask 318464  }
 0x18d   :  { %v671_v36 = vsel %vm669_vm9, %v668_v15, %v667_v35  ;;  %687 = vst.msk [vmem:[#allocation3 + $0x74] sm:$0xf] %vm662_vm12, %v683_v18  ;;  %vm786_vm9 = vcmask 130052  }
 0x18e   :  { %675 = vst.msk [vmem:[#allocation3 + $0x48] sm:$0xf] %vm662_vm12, %v671_v36  ;;  %vm3281_vm12 = vmor %vm786_vm9, %vm408_vm11 }
 0x18f   :  { %815 = vst.msk [vmem:[#allocation3 + $0x74] sm:$0xff] %vm3225_vm5, %v810_v37  ;;  %801 = vst.msk [vmem:[#allocation3 + $0x48] sm:$0xff] %vm3225_vm5, %v796_v38  ;;  %v3266_v12 = vpop.permute.xlu1 %844 }
 0x190   :  { %v818_v15 = vpop.permute.xlu0 %817  ;;  %v950_v55 = vld [vmem:[#allocation3 + $0x170] sm:$0xff]  ;;  %v848_v57 = vrot.slane %v3266_v12, 4 }
 0x191   :  { %v821_v39 = vrot.slane %v818_v15, 4  ;;  %v2192_v40 = vcombine.high %v950_v55, %v950_v55  ;;  %v2191_v41 = vcombine.low %v950_v55, %v950_v55 }
 0x192   :  { %v850_v43 = vsel %vm238_vm3, %v848_v57, %v3266_v12 }
 0x193   :  { %v823_v44 = vsel %vm3944_vm15, %v821_v39, %v818_v15  ;;  %2202 = vmatprep.subr.msk.bf16.mxu0 %vm408_vm11, %v2192_v40  ;;  %v1229_v45 = vsel %vm408_vm11, %v2191_v41, 0  ;;  %855 = vst.msk [vmem:[#allocation3 + $0xf8] sm:$0xff] %vm3225_vm5, %v850_v43  ;;  %v792_v46 = vpop.permute.xlu1 %791 }
 0x194   :  { %828 = vst.msk [vmem:[#allocation3 + $0xa0] sm:$0xff] %vm3225_vm5, %v823_v44  ;;  %1340 = vmatpush1.bf16.msra.mxu0 %v1229_v45  ;;  %v831_v47 = vpop.permute.xlu0 %830  ;;  %v794_v49 = vrot.slane %v792_v46, 4 }
 0x195   :  { %v834_v50 = vrot.slane %v831_v47, 4 }
 0x196   :  { %v2655_v52 = vld [vmem:[#allocation3 + $0x1c] ss:$44 sps:$4 sm:$0xff]   ;;  %v797_v53 = vsel %vm408_vm11, %v793_v33, %v794_v49  ;;  %v2662_v25 = vld [vmem:[#allocation3 + $0x20] ss:$44 sps:$4 sm:$0xff]   ;;  %v2754_v49 = vmov 0.0  }
 0x197   :  { %v837_v54 = vsel %vm836_vm13, %v834_v50, %v831_v47  ;;  %2203 = vmatmul.mubr.msk.bf16.vlgmr.msra.gmra.mrb[0].mxu0 %vm1212_vm14, %v3088_v0  ;;  %v798_v56 = vsel %vm795_vm6, %v797_v53, %v792_v46  ;;  %v3292_v58 = vpop.permute.xlu1 %871  ;;  %1372 = vmatprep.subr.bf16.mxu1 %v2655_v52 }
 0x198   :  { %842 = vst.msk [vmem:[#allocation3 + $0xcc] sm:$0xff] %vm3225_vm5, %v837_v54  ;;  %v774_v59 = vpop.permute.xlu0 %773  ;;  %1445 = vmatprep.mubr.bf16.mxu0 %v2712_v1  ;;  %v875_v60 = vrot.slane %v3292_v58, 4  ;;  %1373 = vmatpush1.bf16.msra.mxu1 %v2653_v51 }
 0x199   :  { %802 = vst.msk [vmem:[#allocation3 + $0x50] sm:$0xff] %vm3281_vm12, %v798_v56  ;;  %v776_v61 = vrot.slane %v774_v59, 4 }
 0x19a   :  { %v878_v21 = vsel %vm877_vm7, %v875_v60, %v3292_v58 }
 0x19b   :  { %v779_v62 = vsel %vm408_vm11, %v775_v4, %v776_v61  ;;  %v2658_v2 = vld [vmem:[#allocation3 + $0x74] ss:$44 sps:$4 sm:$0xff]   ;;  %883 = vst.msk [vmem:[#allocation3 + $0x150] sm:$0xff] %vm3225_vm5, %v878_v21  ;;  %v820_v3 = vpop.permute.xlu1 %819  ;;  %v2668_v40 = vld [vmem:[#allocation3 + $0x78] ss:$44 sps:$4 sm:$0xff]  }
 0x19c   :  { %v780_v1 = vsel %vm777_vm0, %v779_v62, %v774_v59  ;;  %v858_v6 = vpop.permute.xlu0 %857  ;;  %v822_v7 = vrot.slane %v820_v3, 4  ;;  %1374 = vmatprep.subr.bf16.mxu1 %v2658_v2  ;;  %vm891_vm0 = vcmask 310272   ;;  %v1522_v59 = vld [vmem:[%s3884_s3 + $0x88] sm:$0xff]  ;;  %v1505_v62 = vld [vmem:[%s3884_s3] sm:$0xff] }
 0x19d   :  { %788 = vst.msk [vmem:[#allocation3 + $0x24] sm:$0xff] %vm3281_vm12, %v780_v1  ;;  %v861_v9 = vrot.slane %v858_v6, 4  ;;  %1375 = vmatpush1.bf16.msra.mxu1 %v2656_v63  ;;  %v2415_v21 = vpack.c.bf16 %v1522_v59, %v1521_v48  ;;  %v1506_v63 = vld [vmem:[%s3884_s3 + $0x8] sm:$0xff]  ;;  %v1523_v1 = vld [vmem:[%s3884_s3 + $0x90] sm:$0xff] }
 0x19e   :  { %v824_v5 = vsel %vm408_vm11, %v821_v39, %v822_v7  ;;  %v2417_v7 = vpack.c.bf16 %v1506_v63, %v1505_v62  ;;  %v1543_v59 = vld [vmem:[%s3884_s3 + $0x130] sm:$0xff]  ;;  %v1562_v62 = vld [vmem:[%s3884_s3 + $0x1c8] sm:$0xff] }
 0x19f   :  { %v864_v4 = vsel %vm863_vm10, %v861_v9, %v858_v6  ;;  %v2661_v11 = vld [vmem:[#allocation3 + $0xcc] ss:$44 sps:$4 sm:$0xff]   ;;  %v825_v13 = vsel %vm3947_vm1, %v824_v5, %v820_v3  ;;  %v833_v16 = vpop.permute.xlu1 %832 }
 0x1a0   :  { %869 = vst.msk [vmem:[#allocation3 + $0x124] sm:$0xff] %vm3225_vm5, %v864_v4  ;;  %v806_v17 = vpop.permute.xlu0 %805  ;;  %v835_v19 = vrot.slane %v833_v16, 4  ;;  %1376 = vmatprep.subr.bf16.mxu1 %v2661_v11  ;;  %v1524_v3 = vld [vmem:[%s3884_s3 + $0x98] sm:$0xff]  ;;  %v1526_v11 = vld [vmem:[%s3884_s3 + $0xa8] sm:$0xff] }
 0x1a1   :  { %829 = vst.msk [vmem:[#allocation3 + $0xa8] sm:$0xff] %vm3281_vm12, %v825_v13  ;;  %v808_v20 = vrot.slane %v806_v17, 4  ;;  %1377 = vmatpush1.bf16.msra.mxu1 %v2659_v10  ;;  %v2419_v5 = vpack.c.bf16 %v1524_v3, %v1523_v1  ;;  %v1508_v4 = vld [vmem:[%s3884_s3 + $0x18] sm:$0xff]  ;;  %v1525_v10 = vld [vmem:[%s3884_s3 + $0xa0] sm:$0xff]  ;;  %v1518_v1 = vld [vmem:[%s3884_s3 + $0x68] sm:$0xff] }
 0x1a2   :  { %v838_v22 = vsel %vm408_vm11, %v834_v50, %v835_v19  ;;  %v2673_v50 = vld [vmem:[#allocation3 + $0xd0] ss:$44 sps:$4 sm:$0xff]  }
 0x1a3   :  { %v811_v23 = vsel %vm408_vm11, %v807_v32, %v808_v20  ;;  %v839_v24 = vsel %vm836_vm13, %v838_v22, %v833_v16  ;;  %v860_v8 = vpop.permute.xlu1 %859  ;;  %v2665_v32 = vld [vmem:[#allocation3 + $0x120] ss:$44 sps:$4 sm:$0xff]   ;;  %v1553_v16 = vld [vmem:[%s3884_s3 + $0x180] sm:$0xff] }
 0x1a4   :  { %v812_v26 = vsel %vm809_vm2, %v811_v23, %v806_v17  ;;  %v886_v27 = vpop.permute.xlu0 %885  ;;  %v2664_v28 = vld [vmem:[#allocation3 + $0x24] ss:$44 sps:$4 sm:$0xff]   ;;  %843 = vst.msk [vmem:[#allocation3 + $0xd4] sm:$0xff] %vm3281_vm12, %v839_v24  ;;  %v862_v29 = vrot.slane %v860_v8, 4  ;;  %v2676_v52 = vld [vmem:[#allocation3 + $0x28] ss:$44 sps:$4 sm:$0xff]   ;;  %v2423_v24 = vpack.c.bf16 %v1526_v11, %v1525_v10 }
 0x1a5   :  { %816 = vst.msk [vmem:[#allocation3 + $0x7c] sm:$0xff] %vm3281_vm12, %v812_v26  ;;  %v889_v30 = vrot.slane %v886_v27, 4  ;;  %1413 = vmatprep.subr.bf16.mxu0 %v2664_v28  ;;  %v1554_v17 = vld [vmem:[%s3884_s3 + $0x188] sm:$0xff]  ;;  %v1509_v22 = vld [vmem:[%s3884_s3 + $0x20] sm:$0xff]  ;;  %v1527_v26 = vld [vmem:[%s3884_s3 + $0xb0] sm:$0xff] }
 0x1a6   :  { %v865_v42 = vsel %vm408_vm11, %v861_v9, %v862_v29  ;;  %1414 = vmatpush1.bf16.msra.mxu0 %v2662_v25  ;;  %v1507_v9 = vld [vmem:[%s3884_s3 + $0x10] sm:$0xff]  ;;  %v1510_v23 = vld [vmem:[%s3884_s3 + $0x28] sm:$0xff]  ;;  %v1528_v28 = vld [vmem:[%s3884_s3 + $0xb8] sm:$0xff] }
 0x1a7   :  { %v892_v31 = vsel %vm891_vm0, %v889_v30, %v886_v27  ;;  %v2667_v33 = vld [vmem:[#allocation3 + $0x124] ss:$44 sps:$4 sm:$0xff]   ;;  %v866_v34 = vsel %vm863_vm10, %v865_v42, %v860_v8  ;;  %v888_v35 = vpop.permute.xlu1 %887  ;;  %v2677_v54 = vld [vmem:[#allocation3 + $0x128] ss:$44 sps:$4 sm:$0xff]   ;;  %v2421_v20 = vpack.c.bf16 %v1508_v4, %v1507_v9  ;;  %v2447_v8 = vpack.c.bf16 %v1554_v17, %v1553_v16  ;;  %v1538_v25 = vld [vmem:[%s3884_s3 + $0x108] sm:$0xff] }
 0x1a8   :  { %897 = vst.msk [vmem:[#allocation3 + $0x17c] sm:$0xff] %vm3225_vm5, %v892_v31  ;;  %v847_v18 = vpop.permute.xlu0 %846  ;;  %v890_v36 = vrot.slane %v888_v35, 4  ;;  %1378 = vmatprep.subr.bf16.mxu1 %v2667_v33  ;;  %v1537_v27 = vld [vmem:[%s3884_s3 + $0x100] sm:$0xff]  ;;  %v1555_v29 = vld [vmem:[%s3884_s3 + $0x190] sm:$0xff]  ;;  %v2425_v31 = vpack.c.bf16 %v1510_v23, %v1509_v22  ;;  %v1512_v33 = vld [vmem:[%s3884_s3 + $0x38] sm:$0xff] }
 0x1a9   :  { %870 = vst.msk [vmem:[#allocation3 + $0x12c] sm:$0xff] %vm3281_vm12, %v866_v34  ;;  %v849_v37 = vrot.slane %v847_v18, 4  ;;  %1379 = vmatpush1.bf16.msra.mxu1 %v2665_v32  ;;  %v1511_v32 = vld [vmem:[%s3884_s3 + $0x30] sm:$0xff]  ;;  %v2449_v34 = vpack.c.bf16 %v1538_v25, %v1537_v27  ;;  %v1546_v4 = vld [vmem:[%s3884_s3 + $0x148] sm:$0xff]  ;;  %v1536_v10 = vld [vmem:[%s3884_s3 + $0xf8] sm:$0xff] }
 0x1aa   :  { %v893_v38 = vsel %vm408_vm11, %v889_v30, %v890_v36  ;;  %v1556_v30 = vld [vmem:[%s3884_s3 + $0x198] sm:$0xff]  ;;  %v1563_v11 = vld [vmem:[%s3884_s3 + $0x1d0] sm:$0xff]  ;;  %v1585_v23 = vld [vmem:[%s3884_s3 + $0x280] sm:$0xff] }
 0x1ab   :  { %v851_v15 = vsel %vm408_vm11, %v848_v57, %v849_v37  ;;  %v894_v55 = vsel %vm891_vm0, %v893_v38, %v888_v35  ;;  %v2427_v35 = vpack.c.bf16 %v1528_v28, %v1527_v26  ;;  %v2451_v36 = vpack.c.bf16 %v1556_v30, %v1555_v29  ;;  %v1539_v37 = vld [vmem:[%s3884_s3 + $0x110] sm:$0xff]  ;;  %v1540_v38 = vld [vmem:[%s3884_s3 + $0x118] sm:$0xff]  ;;  %v1586_v27 = vld [vmem:[%s3884_s3 + $0x288] sm:$0xff] }
 0x1ac   :  { %v852_v14 = vsel %vm238_vm3, %v851_v15, %v847_v18  ;;  %v874_v39 = vpop.permute.xlu0 %873  ;;  %v2670_v41 = vld [vmem:[#allocation3 + $0x7c] ss:$44 sps:$4 sm:$0xff]   ;;  %898 = vst.msk [vmem:[#allocation3 + $0x184] sm:$0xff] %vm3281_vm12, %v894_v55  ;;  %vm2755_vm3 = vmmov 0   ;;  %v2680_v58 = vld [vmem:[#allocation3 + $0x80] ss:$44 sps:$4 sm:$0xff]  }
 0x1ad   :  { %856 = vst.msk [vmem:[#allocation3 + $0x100] sm:$0xff] %vm3281_vm12, %v852_v14  ;;  %v876_v43 = vrot.slane %v874_v39, 4  ;;  %1415 = vmatprep.subr.bf16.mxu0 %v2670_v41  ;;  %v1529_v18 = vld [vmem:[%s3884_s3 + $0xc0] sm:$0xff]  ;;  %v1530_v15 = vld [vmem:[%s3884_s3 + $0xc8] sm:$0xff]  ;;  %v1519_v17 = vld [vmem:[%s3884_s3 + $0x70] sm:$0xff] }
 0x1ae   :  { %1416 = vmatpush1.bf16.msra.mxu0 %v2668_v40  ;;  %v1557_v55 = vld [vmem:[%s3884_s3 + $0x1a0] sm:$0xff]  ;;  %v1558_v14 = vld [vmem:[%s3884_s3 + $0x1a8] sm:$0xff]  ;;  %v1547_v26 = vld [vmem:[%s3884_s3 + $0x150] sm:$0xff] }
 0x1af   :  { %v879_v12 = vsel %vm408_vm11, %v875_v60, %v876_v43  ;;  %v951_v57 = vld [vmem:[#allocation3 + $0x178] sm:$0xff]  ;;  %v1513_v40 = vld [vmem:[%s3884_s3 + $0x40] sm:$0xff]  ;;  %v2453_v43 = vpack.c.bf16 %v1540_v38, %v1539_v37  ;;  %v1551_v37 = vld [vmem:[%s3884_s3 + $0x170] sm:$0xff] }
 0x1b0   :  { %v880_v44 = vsel %vm877_vm7, %v879_v12, %v874_v39  ;;  %v2194_v45 = vcombine.high %v951_v57, %v951_v57  ;;  %v2193_v46 = vcombine.low %v951_v57, %v951_v57  ;;  %v2429_v39 = vpack.c.bf16 %v1512_v33, %v1511_v32  ;;  %v1514_v41 = vld [vmem:[%s3884_s3 + $0x48] sm:$0xff]  ;;  %v1531_v57 = vld [vmem:[%s3884_s3 + $0xd0] sm:$0xff]  ;;  %v1565_v25 = vld [vmem:[%s3884_s3 + $0x1e0] sm:$0xff] }
 0x1b1   :  { %884 = vst.msk [vmem:[#allocation3 + $0x158] sm:$0xff] %vm3281_vm12, %v880_v44  ;;  %v2431_v12 = vpack.c.bf16 %v1530_v15, %v1529_v18  ;;  %v1541_v44 = vld [vmem:[%s3884_s3 + $0x120] sm:$0xff]  ;;  %v1566_v28 = vld [vmem:[%s3884_s3 + $0x1e8] sm:$0xff]  ;;  %v1568_v18 = vld [vmem:[%s3884_s3 + $0x1f8] sm:$0xff] }
 0x1b2   :  { %2204 = vmatprep.subr.msk.bf16.mxu1 %vm408_vm11, %v2194_v45  ;;  %v1235_v47 = vsel %vm408_vm11, %v2193_v46, 0  ;;  %v1542_v45 = vld [vmem:[%s3884_s3 + $0x128] sm:$0xff]  ;;  %v1532_v46 = vld [vmem:[%s3884_s3 + $0xd8] sm:$0xff]  ;;  %v1549_v32 = vld [vmem:[%s3884_s3 + $0x160] sm:$0xff] }
 0x1b3   :  { %1381 = vmatpush1.bf16.msra.mxu1 %v1235_v47  ;;  %v952_v53 = vld [vmem:[#allocation3 + $0x180] sm:$0xff]  ;;  %v2685_v19 = vld [vmem:[#allocation3 + $0x188] ss:$0 sps:$4 sm:$0xff]   ;;  %v2457_v48 = vpack.c.bf16 %v1542_v45, %v1541_v44  ;;  %v1550_v33 = vld [vmem:[%s3884_s3 + $0x168] sm:$0xff] }
 0x1b4   :  { %2394 = vmatprep.subr.bf16.mxu1 %v2754_v49  ;;  %v2675_v51 = vld [vmem:[#allocation3 + $0xd4] ss:$44 sps:$4 sm:$0xff]   ;;  %v2196_v60 = vcombine.high %v952_v53, %v952_v53  ;;  %v2195_v61 = vcombine.low %v952_v53, %v952_v53  ;;  %v2682_v2 = vld [vmem:[#allocation3 + $0xd8] ss:$44 sps:$4 sm:$0xff]   ;;  %v1247_v42 = vsel %vm408_vm11, %v2685_v19, 0  ;;  %v1516_v53 = vld [vmem:[%s3884_s3 + $0x58] sm:$0xff] }
 0x1b5   :  { %1417 = vmatprep.subr.bf16.mxu0 %v2675_v51  ;;  %v1559_v47 = vld [vmem:[%s3884_s3 + $0x1b0] sm:$0xff]  ;;  %v2433_v51 = vpack.c.bf16 %v1514_v41, %v1513_v40  ;;  %v1520_v19 = vld [vmem:[%s3884_s3 + $0x78] sm:$0xff] }
 0x1b6   :  { %2205 = vmatmul.mubr.msk.bf16.vlgmr.msra.gmra.mrb[8].mxu1 %vm1212_vm14, %v3088_v0  ;;  %1418 = vmatpush1.bf16.msra.mxu0 %v2673_v50  ;;  %v1241_v6 = vsel %vm408_vm11, %v2195_v61, 0  ;;  %v1560_v50 = vld [vmem:[%s3884_s3 + $0x1b8] sm:$0xff]  ;;  %v1534_v61 = vld [vmem:[%s3884_s3 + $0xe8] sm:$0xff]  ;;  %v2445_v29 = vpack.c.bf16 %v1520_v19, %v1519_v17  ;;  %v1587_v45 = vld [vmem:[%s3884_s3 + $0x290] sm:$0xff] }
 0x1b7   :  { %2395 = vmatpush3.bf16.msra.mxu1 %v2676_v52  ;;  %2404 = vmatprep.mubr.msk.bf16.mxu1 %vm2755_vm3, %v2754_v49  ;;  %v1515_v52 = vld [vmem:[%s3884_s3 + $0x50] sm:$0xff]  ;;  %v1552_v38 = vld [vmem:[%s3884_s3 + $0x178] sm:$0xff] }
 0x1b8   :  { %2396 = vmatprep.subr.bf16.mxu1 %v2754_v49  ;;  %v2679_v56 = vld [vmem:[#allocation3 + $0x12c] ss:$44 sps:$4 sm:$0xff]   ;;  %v2684_v13 = vld [vmem:[#allocation3 + $0x130] ss:$44 sps:$4 sm:$0xff]   ;;  %v2437_v63 = vpack.c.bf16 %v1516_v53, %v1515_v52  ;;  %v2477_v15 = vpack.c.bf16 %v1552_v38, %v1551_v37 }
 0x1b9   :  { %1419 = vmatprep.subr.bf16.mxu0 %v2679_v56  ;;  %v1533_v56 = vld [vmem:[%s3884_s3 + $0xe0] sm:$0xff]  ;;  %v1596_v17 = vld [vmem:[%s3884_s3 + $0x2d8] sm:$0xff] }
 0x1ba   :  { %1420 = vmatpush1.bf16.msra.mxu0 %v2677_v54  ;;  %v2435_v54 = vpack.c.bf16 %v1532_v46, %v1531_v57  ;;  %v1569_v57 = vld [vmem:[%s3884_s3 + $0x200] sm:$0xff]  ;;  %v1588_v46 = vld [vmem:[%s3884_s3 + $0x298] sm:$0xff] }
 0x1bb   :  { %2397 = vmatpush3.bf16.msra.mxu1 %v2680_v58  ;;  %2206 = vmatprep.subr.msk.bf16.mxu0 %vm408_vm11, %v2196_v60  ;;  %v2459_v58 = vpack.c.bf16 %v1560_v50, %v1559_v47  ;;  %v1544_v60 = vld [vmem:[%s3884_s3 + $0x138] sm:$0xff]  ;;  %vm1667_vm11 = vcmask 130048  }
 0x1bc   :  { %2398 = vmatprep.subr.bf16.mxu1 %v2754_v49  ;;  %v2461_v3 = vpack.c.bf16 %v1544_v60, %v1543_v59  ;;  %v1590_v59 = vld [vmem:[%s3884_s3 + $0x2a8] sm:$0xff] }
 0x1bd   :  { %v3572_v40 = vpop.permute.xlu0 %957 }
 0x1be   :  { %1422 = vmatpush1.bf16.msra.mxu0 %v1241_v6  ;;  %v2439_v6 = vpack.c.bf16 %v1534_v61, %v1533_v56  ;;  %v1572_v56 = vld [vmem:[%s3884_s3 + $0x218] sm:$0xff] }
 0x1bf   :  { %2399 = vmatpush3.bf16.msra.mxu1 %v2682_v2  ;;  %2416 = vmatprep.subr.bf16.mxu0 %v2415_v21  ;;  %v1561_v21 = vld [vmem:[%s3884_s3 + $0x1c0] sm:$0xff] }
 0x1c0   :  { %2400 = vmatprep.subr.bf16.mxu1 %v2754_v49  ;;  %v1517_v2 = vld [vmem:[%s3884_s3 + $0x60] sm:$0xff]  ;;  %v2463_v9 = vpack.c.bf16 %v1562_v62, %v1561_v21  ;;  %v1574_v62 = vld [vmem:[%s3884_s3 + $0x228] sm:$0xff] }
 0x1c1   :  { %2207 = vmatmul.mubr.msk.bf16.vlgmr.msra.gmra.mrb[4].mxu0 %vm1212_vm14, %v3088_v0  ;;  %v2441_v16 = vpack.c.bf16 %v1518_v1, %v1517_v2  ;;  %v1573_v21 = vld [vmem:[%s3884_s3 + $0x220] sm:$0xff]  ;;  %v1592_v2 = vld [vmem:[%s3884_s3 + $0x2b8] sm:$0xff] }
 0x1c2   :  { %2418 = vmatpush3.bf16.msra.mxu0 %v2417_v7  ;;  %v1535_v7 = vld [vmem:[%s3884_s3 + $0xf0] sm:$0xff]  ;;  %v2489_v1 = vpack.c.bf16 %v1574_v62, %v1573_v21 }
 0x1c3   :  { %2401 = vmatpush3.bf16.msra.mxu1 %v2684_v13  ;;  %2420 = vmatprep.subr.bf16.mxu0 %v2419_v5  ;;  %v1545_v5 = vld [vmem:[%s3884_s3 + $0x140] sm:$0xff]  ;;  %v1564_v13 = vld [vmem:[%s3884_s3 + $0x1d8] sm:$0xff]  ;;  %v2443_v22 = vpack.c.bf16 %v1536_v10, %v1535_v7  ;;  %v1607_v62 = vld [vmem:[%s3884_s3 + $0x330] sm:$0xff] }
 0x1c4   :  { %2402 = vmatprep.subr.bf16.mxu1 %v2754_v49  ;;  %v1576_v7 = vld [vmem:[%s3884_s3 + $0x238] sm:$0xff] }
 0x1c6   :  { %2422 = vmatpush3.bf16.msra.mxu0 %v2421_v20  ;;  %v2465_v20 = vpack.c.bf16 %v1546_v4, %v1545_v5  ;;  %v1594_v5 = vld [vmem:[%s3884_s3 + $0x2c8] sm:$0xff] }
 0x1c7   :  { %2403 = vmatpush3.bf16.msra.mxu1 %v1247_v42  ;;  %2424 = vmatprep.subr.bf16.mxu0 %v2423_v24  ;;  %v2467_v24 = vpack.c.bf16 %v1564_v13, %v1563_v11  ;;  %v2479_v42 = vpack.c.bf16 %v1586_v27, %v1585_v23  ;;  %v1577_v11 = vld [vmem:[%s3884_s3 + $0x240] sm:$0xff]  ;;  %v1578_v13 = vld [vmem:[%s3884_s3 + $0x248] sm:$0xff]  ;;  %v1580_v23 = vld [vmem:[%s3884_s3 + $0x258] sm:$0xff] }
 0x1c8   :  { %2448 = vmatprep.subr.bf16.mxu1 %v2447_v8  ;;  %v1548_v8 = vld [vmem:[%s3884_s3 + $0x158] sm:$0xff]  ;;  %v2497_v19 = vpack.c.bf16 %v1578_v13, %v1577_v11 }
 0x1c9   :  { %v2469_v30 = vpack.c.bf16 %v1548_v8, %v1547_v26  ;;  %v1598_v26 = vld [vmem:[%s3884_s3 + $0x2e8] sm:$0xff]  ;;  %v1652_v11 = vld [vmem:[%s3884_s3 + $0x498] sm:$0xff] }
 0x1ca   :  { %2405 = vmatmul.mubr.msk.bf16.vlgmr.msra.gmra.mrb[12].mxu1 %vm1212_vm14, %v3088_v0  ;;  %2426 = vmatpush3.bf16.msra.mxu0 %v2425_v31  ;;  %v2455_v0 = vpack.c.bf16 %v1558_v14, %v1557_v55  ;;  %v2471_v31 = vpack.c.bf16 %v1566_v28, %v1565_v25  ;;  %v1617_v55 = vld [vmem:[%s3884_s3 + $0x380] sm:$0xff]  ;;  %v1618_v14 = vld [vmem:[%s3884_s3 + $0x388] sm:$0xff]  ;;  %vm2123_vm14 = vcmask 60416  }
 0x1cb   :  { %2450 = vmatpush3.bf16.msra.mxu1 %v2449_v34  ;;  %2428 = vmatprep.subr.bf16.mxu0 %v2427_v35  ;;  %v2473_v34 = vpack.c.bf16 %v1550_v33, %v1549_v32  ;;  %v1567_v35 = vld [vmem:[%s3884_s3 + $0x1f0] sm:$0xff]  ;;  %v1581_v25 = vld [vmem:[%s3884_s3 + $0x260] sm:$0xff]  ;;  %v1582_v28 = vld [vmem:[%s3884_s3 + $0x268] sm:$0xff] }
 0x1cc   :  { %2452 = vmatprep.subr.bf16.mxu1 %v2451_v36  ;;  %v2475_v36 = vpack.c.bf16 %v1568_v18, %v1567_v35  ;;  %v1583_v32 = vld [vmem:[%s3884_s3 + $0x270] sm:$0xff]  ;;  %v1584_v33 = vld [vmem:[%s3884_s3 + $0x278] sm:$0xff]  ;;  %v1650_v35 = vld [vmem:[%s3884_s3 + $0x488] sm:$0xff] }
 0x1cd   :  { %v2509_v18 = vpack.c.bf16 %v1584_v33, %v1583_v32  ;;  %v1611_v33 = vld [vmem:[%s3884_s3 + $0x350] sm:$0xff] }
 0x1ce   :  { %2430 = vmatpush3.bf16.msra.mxu0 %v2429_v39  ;;  %v2511_v39 = vpack.c.bf16 %v1618_v14, %v1617_v55  ;;  %v1601_v55 = vld [vmem:[%s3884_s3 + $0x300] sm:$0xff]  ;;  %v1602_v14 = vld [vmem:[%s3884_s3 + $0x308] sm:$0xff] }
 0x1cf   :  { %2454 = vmatpush3.bf16.msra.mxu1 %v2453_v43  ;;  %2432 = vmatprep.subr.bf16.mxu0 %v2431_v12 }
 0x1d0   :  { %2456 = vmatprep.subr.bf16.mxu1 %v2455_v0  ;;  %v1570_v0 = vld [vmem:[%s3884_s3 + $0x208] sm:$0xff] }
 0x1d1   :  { %v2481_v53 = vpack.c.bf16 %v1570_v0, %v1569_v57 }
 0x1d2   :  { %2434 = vmatpush3.bf16.msra.mxu0 %v2433_v51 }
 0x1d3   :  { %2458 = vmatpush3.bf16.msra.mxu1 %v2457_v48  ;;  %2436 = vmatprep.subr.bf16.mxu0 %v2435_v54  ;;  %v2483_v48 = vpack.c.bf16 %v1588_v46, %v1587_v45  ;;  %v1571_v54 = vld [vmem:[%s3884_s3 + $0x210] sm:$0xff] }
 0x1d4   :  { %2460 = vmatprep.subr.bf16.mxu1 %v2459_v58  ;;  %v1589_v58 = vld [vmem:[%s3884_s3 + $0x2a0] sm:$0xff]  ;;  %v2485_v60 = vpack.c.bf16 %v1572_v56, %v1571_v54  ;;  %v1606_v56 = vld [vmem:[%s3884_s3 + $0x328] sm:$0xff] }
 0x1d5   :  { %v2487_v61 = vpack.c.bf16 %v1590_v59, %v1589_v58  ;;  %v1605_v54 = vld [vmem:[%s3884_s3 + $0x320] sm:$0xff]  ;;  %v1623_v58 = vld [vmem:[%s3884_s3 + $0x3b0] sm:$0xff]  ;;  %v1624_v59 = vld [vmem:[%s3884_s3 + $0x3b8] sm:$0xff] }
 0x1d6   :  { %2438 = vmatpush3.bf16.msra.mxu0 %v2437_v63  ;;  %v1591_v63 = vld [vmem:[%s3884_s3 + $0x2b0] sm:$0xff]  ;;  %v2523_v21 = vpack.c.bf16 %v1624_v59, %v1623_v58  ;;  %v1641_v58 = vld [vmem:[%s3884_s3 + $0x440] sm:$0xff]  ;;  %v1642_v59 = vld [vmem:[%s3884_s3 + $0x448] sm:$0xff] }
 0x1d7   :  { %2462 = vmatpush3.bf16.msra.mxu1 %v2461_v3  ;;  %2440 = vmatprep.subr.bf16.mxu0 %v2439_v6  ;;  %v2491_v3 = vpack.c.bf16 %v1592_v2, %v1591_v63  ;;  %v1575_v6 = vld [vmem:[%s3884_s3 + $0x230] sm:$0xff]  ;;  %v1608_v63 = vld [vmem:[%s3884_s3 + $0x338] sm:$0xff]  ;;  %v1633_v2 = vld [vmem:[%s3884_s3 + $0x400] sm:$0xff] }
 0x1d8   :  { %2464 = vmatprep.subr.bf16.mxu1 %v2463_v9  ;;  %v1593_v9 = vld [vmem:[%s3884_s3 + $0x2c0] sm:$0xff]  ;;  %v2493_v4 = vpack.c.bf16 %v1576_v7, %v1575_v6  ;;  %v1634_v6 = vld [vmem:[%s3884_s3 + $0x408] sm:$0xff] }
 0x1d9   :  { %v2495_v10 = vpack.c.bf16 %v1594_v5, %v1593_v9  ;;  %v1625_v7 = vld [vmem:[%s3884_s3 + $0x3c0] sm:$0xff]  ;;  %v1626_v9 = vld [vmem:[%s3884_s3 + $0x3c8] sm:$0xff] }
 0x1da   :  { %2442 = vmatpush3.bf16.msra.mxu0 %v2441_v16  ;;  %v1595_v16 = vld [vmem:[%s3884_s3 + $0x2d0] sm:$0xff] }
 0x1db   :  { %2466 = vmatpush3.bf16.msra.mxu1 %v2465_v20  ;;  %2444 = vmatprep.subr.bf16.mxu0 %v2443_v22  ;;  %v2499_v20 = vpack.c.bf16 %v1596_v17, %v1595_v16  ;;  %v1579_v22 = vld [vmem:[%s3884_s3 + $0x250] sm:$0xff]  ;;  %v2525_v16 = vpack.c.bf16 %v1608_v63, %v1607_v62  ;;  %v2561_v62 = vpack.c.bf16 %v1642_v59, %v1641_v58 }
 0x1dc   :  { %2468 = vmatprep.subr.bf16.mxu1 %v2467_v24  ;;  %v1597_v24 = vld [vmem:[%s3884_s3 + $0x2e0] sm:$0xff]  ;;  %v2501_v8 = vpack.c.bf16 %v1580_v23, %v1579_v22  ;;  %v1610_v23 = vld [vmem:[%s3884_s3 + $0x348] sm:$0xff] }
 0x1dd   :  { %v2503_v27 = vpack.c.bf16 %v1598_v26, %v1597_v24  ;;  %v1609_v22 = vld [vmem:[%s3884_s3 + $0x340] sm:$0xff]  ;;  %v1635_v24 = vld [vmem:[%s3884_s3 + $0x410] sm:$0xff] }
 0x1de   :  { %2446 = vmatpush3.bf16.msra.mxu0 %v2445_v29  ;;  %v1599_v29 = vld [vmem:[%s3884_s3 + $0x2f0] sm:$0xff] }
 0x1df   :  { %2470 = vmatpush3.bf16.msra.mxu1 %v2469_v30  ;;  %2480 = vmatprep.subr.bf16.mxu0 %v2479_v42  ;;  %v1600_v30 = vld [vmem:[%s3884_s3 + $0x2f8] sm:$0xff]  ;;  %v2505_v42 = vpack.c.bf16 %v1582_v28, %v1581_v25  ;;  %v1627_v25 = vld [vmem:[%s3884_s3 + $0x3d0] sm:$0xff] }
 0x1e0   :  { %2472 = vmatprep.subr.bf16.mxu1 %v2471_v31  ;;  %v2507_v31 = vpack.c.bf16 %v1600_v30, %v1599_v29  ;;  %v1628_v28 = vld [vmem:[%s3884_s3 + $0x3d8] sm:$0xff]  ;;  %v1653_v29 = vld [vmem:[%s3884_s3 + $0x4a0] sm:$0xff]  ;;  %v1654_v30 = vld [vmem:[%s3884_s3 + $0x4a8] sm:$0xff] }
 0x1e1   :  { %v2531_v32 = vpack.c.bf16 %v1628_v28, %v1627_v25 }
 0x1e3   :  { %2474 = vmatpush3.bf16.msra.mxu1 %v2473_v34  ;;  %v1649_v34 = vld [vmem:[%s3884_s3 + $0x480] sm:$0xff] }
 0x1e4   :  { %2476 = vmatprep.subr.bf16.mxu1 %v2475_v36  ;;  %v2543_v36 = vpack.c.bf16 %v1650_v35, %v1649_v34  ;;  %v1612_v34 = vld [vmem:[%s3884_s3 + $0x358] sm:$0xff]  ;;  %v1637_v35 = vld [vmem:[%s3884_s3 + $0x420] sm:$0xff] }
 0x1e7   :  { %2478 = vmatpush3.bf16.msra.mxu1 %v2477_v15 }
 0x1e8   :  { %2512 = vmatprep.subr.bf16.mxu1 %v2511_v39 }
 0x206   :  { %v1283_v41 = vpop.f32.mrb[0].mxu1 }
 0x207   :  { %v1285_v43 = vpop.f32.mrb[1].mxu1  ;;  %v1284_v12 = vadd.f32 %v1283_v41, %v3572_v40 }
 0x208   :  { %v1286_v44 = vadd.f32 %v1285_v43, %v3572_v40  ;;  %v1287_v47 = vpop.f32.mrb[2].mxu1  ;;  %v1619_v43 = vld [vmem:[%s3884_s3 + $0x390] sm:$0xff] }
 0x209   :  { %v1494_v50 = vmax.f32 %v1284_v12, 0.0  ;;  %v1288_v51 = vpop.f32.mrb[3].mxu1  ;;  %v1620_v12 = vld [vmem:[%s3884_s3 + $0x398] sm:$0xff]  ;;  %v1603_v47 = vld [vmem:[%s3884_s3 + $0x310] sm:$0xff] }
 0x20a   :  { %v1495_v52 = vmax.f32 %v1286_v44, 0.0  ;;  %v2513_v44 = vpack.c.bf16 %v1602_v14, %v1601_v55  ;;  %v2515_v46 = vpack.c.bf16 %v1620_v12, %v1619_v43  ;;  %v1621_v51 = vld [vmem:[%s3884_s3 + $0x3a0] sm:$0xff]  ;;  %v1656_v55 = vld [vmem:[%s3884_s3 + $0x4b8] sm:$0xff]  ;;  %v2533_v14 = vpack.c.bf16 %v1612_v34, %v1611_v33  ;;  %v1614_v12 = vld [vmem:[%s3884_s3 + $0x368] sm:$0xff] }
 0x20b   :  { %v1613_v43 = vld [vmem:[%s3884_s3 + $0x360] sm:$0xff]  ;;  %v1666_v33 = vld [vmem:[%s3884_s3 + $0x508] sm:$0xff] }
 0x20c   :  { %1735 = vmatprep.mubr.f32.mxu0 %v1495_v52  ;;  %v1622_v52 = vld [vmem:[%s3884_s3 + $0x3a8] sm:$0xff] }
 0x20d   :  { %1736 = vmatmul.mubr.f32.vlgmr.msra.gmra.mrb[8].mxu0 %v1494_v50  ;;  %v1604_v50 = vld [vmem:[%s3884_s3 + $0x318] sm:$0xff] }
 0x20e   :  { %2482 = vmatpush3.bf16.msra.mxu0 %v2481_v53  ;;  %v2517_v53 = vpack.c.bf16 %v1604_v50, %v1603_v47  ;;  %v1657_v47 = vld [vmem:[%s3884_s3 + $0x4c0] sm:$0xff]  ;;  %v1658_v50 = vld [vmem:[%s3884_s3 + $0x4c8] sm:$0xff] }
 0x20f   :  { %2484 = vmatprep.subr.bf16.mxu0 %v2483_v48  ;;  %v2519_v48 = vpack.c.bf16 %v1622_v52, %v1621_v51  ;;  %v2537_v51 = vpack.c.bf16 %v1614_v12, %v1613_v43 }
 0x212   :  { %2486 = vmatpush3.bf16.msra.mxu0 %v2485_v60  ;;  %v2521_v60 = vpack.c.bf16 %v1606_v56, %v1605_v54  ;;  %v1616_v54 = vld [vmem:[%s3884_s3 + $0x378] sm:$0xff]  ;;  %v2559_v56 = vpack.c.bf16 %v1658_v50, %v1657_v47 }
 0x213   :  { %2488 = vmatprep.subr.bf16.mxu0 %v2487_v61 }
 0x216   :  { %2490 = vmatpush3.bf16.msra.mxu0 %v2489_v1 }
 0x217   :  { %2492 = vmatprep.subr.bf16.mxu0 %v2491_v3 }
 0x21a   :  { %2494 = vmatpush3.bf16.msra.mxu0 %v2493_v4 }
 0x21b   :  { %2496 = vmatprep.subr.bf16.mxu0 %v2495_v10  ;;  %v1651_v10 = vld [vmem:[%s3884_s3 + $0x490] sm:$0xff] }
 0x21e   :  { %2498 = vmatpush3.bf16.msra.mxu0 %v2497_v19  ;;  %v2545_v19 = vpack.c.bf16 %v1634_v6, %v1633_v2  ;;  %v1643_v2 = vld [vmem:[%s3884_s3 + $0x450] sm:$0xff]  ;;  %v1662_v6 = vld [vmem:[%s3884_s3 + $0x4e8] sm:$0xff] }
 0x21f   :  { %2500 = vmatprep.subr.bf16.mxu0 %v2499_v20  ;;  %v2527_v20 = vpack.c.bf16 %v1626_v9, %v1625_v7 }
 0x222   :  { %2502 = vmatpush3.bf16.msra.mxu0 %v2501_v8  ;;  %v2547_v8 = vpack.c.bf16 %v1652_v11, %v1651_v10  ;;  %v1663_v10 = vld [vmem:[%s3884_s3 + $0x4f0] sm:$0xff]  ;;  %v1664_v11 = vld [vmem:[%s3884_s3 + $0x4f8] sm:$0xff] }
 0x223   :  { %2504 = vmatprep.subr.bf16.mxu0 %v2503_v27  ;;  %v1636_v27 = vld [vmem:[%s3884_s3 + $0x418] sm:$0xff] }
 0x226   :  { %2506 = vmatpush3.bf16.msra.mxu0 %v2505_v42  ;;  %v2529_v42 = vpack.c.bf16 %v1610_v23, %v1609_v22 }
 0x227   :  { %2508 = vmatprep.subr.bf16.mxu0 %v2507_v31  ;;  %v2549_v31 = vpack.c.bf16 %v1636_v27, %v1635_v24 }
 0x22a   :  { %2510 = vmatpush3.bf16.msra.mxu0 %v2509_v18  ;;  %v2551_v18 = vpack.c.bf16 %v1654_v30, %v1653_v29  ;;  %v2756_v29 = vmov 0.0|0.0  }
 0x22b   :  { %2544 = vmatprep.subr.bf16.mxu0 %v2543_v36  ;;  %v1638_v36 = vld [vmem:[%s3884_s3 + $0x428] sm:$0xff] }
 0x25c   :  { %v1324_v37 = vpop.f32.mrb[4].mxu1 }
 0x25d   :  { %v1325_v38 = vadd.f32 %v1324_v37, %v3572_v40  ;;  %v1326_v15 = vpop.f32.mrb[5].mxu1  ;;  %v1629_v37 = vld [vmem:[%s3884_s3 + $0x3e0] sm:$0xff] }
 0x25e   :  { %v1327_v39 = vadd.f32 %v1326_v15, %v3572_v40  ;;  %v1328_v41 = vpop.f32.mrb[6].mxu1  ;;  %v1655_v15 = vld [vmem:[%s3884_s3 + $0x4b0] sm:$0xff] }
 0x25f   :  { %v1329_v57 = vpop.f32.mrb[7].mxu1  ;;  %v1496_v45 = vmax.f32 %v1325_v38, 0.0  ;;  %v1630_v38 = vld [vmem:[%s3884_s3 + $0x3e8] sm:$0xff] }
 0x260   :  { %v1497_v0 = vmax.f32 %v1327_v39, 0.0  ;;  %v2553_v39 = vpack.c.bf16 %v1638_v36, %v1637_v35  ;;  %v2535_v41 = vpack.c.bf16 %v1630_v38, %v1629_v37  ;;  %v1639_v57 = vld [vmem:[%s3884_s3 + $0x430] sm:$0xff] }
 0x262   :  { %1805 = vmatprep.mubr.f32.mxu1 %v1497_v0  ;;  %v2555_v0 = vpack.c.bf16 %v1656_v55, %v1655_v15 }
 0x263   :  { %1806 = vmatmul.mubr.f32.vlgmr.msra.gmra.mrb[16].mxu1 %v1496_v45  ;;  %v1631_v45 = vld [vmem:[%s3884_s3 + $0x3f0] sm:$0xff] }
 0x264   :  { %2514 = vmatpush3.bf16.msra.mxu1 %v2513_v44  ;;  %v1640_v44 = vld [vmem:[%s3884_s3 + $0x438] sm:$0xff] }
 0x265   :  { %2516 = vmatprep.subr.bf16.mxu1 %v2515_v46  ;;  %v1632_v46 = vld [vmem:[%s3884_s3 + $0x3f8] sm:$0xff]  ;;  %v2557_v52 = vpack.c.bf16 %v1640_v44, %v1639_v57 }
 0x268   :  { %2518 = vmatpush3.bf16.msra.mxu1 %v2517_v53  ;;  %v2539_v53 = vpack.c.bf16 %v1632_v46, %v1631_v45 }
 0x269   :  { %2520 = vmatprep.subr.bf16.mxu1 %v2519_v48  ;;  %v1615_v48 = vld [vmem:[%s3884_s3 + $0x370] sm:$0xff] }
 0x26a   :  { %v1365_v61 = vpop.f32.mrb[0].mxu0 }
 0x26b   :  { %v1366_v1 = vadd.f32 %v1365_v61, %v3572_v40  ;;  %v1367_v3 = vpop.f32.mrb[1].mxu0  ;;  %v1660_v61 = vld [vmem:[%s3884_s3 + $0x4d8] sm:$0xff] }
 0x26c   :  { %v1368_v5 = vadd.f32 %v1367_v3, %v3572_v40  ;;  %v1369_v4 = vpop.f32.mrb[2].mxu0  ;;  %2522 = vmatpush3.bf16.msra.mxu1 %v2521_v60  ;;  %v1659_v60 = vld [vmem:[%s3884_s3 + $0x4d0] sm:$0xff]  ;;  %v1661_v3 = vld [vmem:[%s3884_s3 + $0x4e0] sm:$0xff] }
 0x26d   :  { %v1370_v13 = vpop.f32.mrb[3].mxu0  ;;  %2524 = vmatprep.subr.bf16.mxu1 %v2523_v21  ;;  %v1498_v26 = vmax.f32 %v1366_v1, 0.0  ;;  %v2541_v21 = vpack.c.bf16 %v1616_v54, %v1615_v48  ;;  %v2563_v63 = vpack.c.bf16 %v1660_v61, %v1659_v60  ;;  %v1644_v1 = vld [vmem:[%s3884_s3 + $0x458] sm:$0xff]  ;;  %v2567_v9 = vpack.c.bf16 %v1662_v6, %v1661_v3  ;;  %v1646_v4 = vld [vmem:[%s3884_s3 + $0x468] sm:$0xff] }
 0x26e   :  { %v1499_v17 = vmax.f32 %v1368_v5, 0.0  ;;  %v2565_v7 = vpack.c.bf16 %v1644_v1, %v1643_v2  ;;  %v1645_v5 = vld [vmem:[%s3884_s3 + $0x460] sm:$0xff] }
 0x26f   :  { %v2569_v13 = vpack.c.bf16 %v1646_v4, %v1645_v5 }
 0x270   :  { %1875 = vmatprep.mubr.f32.mxu0 %v1499_v17  ;;  %2526 = vmatpush3.bf16.msra.mxu1 %v2525_v16  ;;  %v2571_v16 = vpack.c.bf16 %v1664_v11, %v1663_v10  ;;  %v1647_v17 = vld [vmem:[%s3884_s3 + $0x470] sm:$0xff] }
 0x271   :  { %1876 = vmatmul.mubr.f32.vlgmr.msra.gmra.mrb[10].mxu0 %v1498_v26  ;;  %2528 = vmatprep.subr.bf16.mxu1 %v2527_v20 }
 0x272   :  { %2546 = vmatpush3.bf16.msra.mxu0 %v2545_v19  ;;  %v1648_v19 = vld [vmem:[%s3884_s3 + $0x478] sm:$0xff] }
 0x273   :  { %2548 = vmatprep.subr.bf16.mxu0 %v2547_v8  ;;  %v2573_v24 = vpack.c.bf16 %v1648_v19, %v1647_v17 }
 0x274   :  { %2530 = vmatpush3.bf16.msra.mxu1 %v2529_v42 }
 0x275   :  { %2532 = vmatprep.subr.bf16.mxu1 %v2531_v32  ;;  %v1665_v32 = vld [vmem:[%s3884_s3 + $0x500] sm:$0xff]  ;;  %s2757_s3 = smov [#allocation4]  }
 0x276   :  { %2550 = vmatpush3.bf16.msra.mxu0 %v2549_v31  ;;  %v2576_v37 = vpack.c.bf16 %v1666_v33, %v1665_v32  ;;  %s2131_s23 = sshll.u32 %s2757_s3, 4  ;;  %s2132_s23 = int_to_ptr.vmem [resolvable:$true] %s2131_s23 }
 0x277   :  { %2552 = vmatprep.subr.bf16.mxu0 %v2551_v18  ;;  %s2686_s24 = scalar_lea.vmem %s2132_s23, 64  ;;  %p2691_p1 = scmp.lt.s32.totalorder %s2132_s23, %s2132_s23 }
 0x278   :  { %2534 = vmatpush3.bf16.msra.mxu1 %v2533_v14  ;;  %p2687_p0 = scmp.ne.s32.totalorder %s2132_s23, %s2686_s24  ;;  %p2692_p2 = scmp.lt.s32.totalorder %s2686_s24, %s2686_s24 }
 0x279   :  { %2536 = vmatprep.subr.bf16.mxu1 %v2535_v41 }
 0x27a   :  { %2554 = vmatpush3.bf16.msra.mxu0 %v2553_v39  ;;  %p2693_p3 = por %p2692_p2, %p2691_p1 }
 0x27b   :  { %2556 = vmatprep.subr.bf16.mxu0 %v2555_v0 }
 0x27c   :  { %2538 = vmatpush3.bf16.msra.mxu1 %v2537_v51  ;;  %p2694_p4 = pnand %p2693_p3, %p2687_p0 }
 0x27d   :  { %2540 = vmatprep.subr.bf16.mxu1 %v2539_v53 }
 0x27e   :  { %2558 = vmatpush3.bf16.msra.mxu0 %v2557_v52 }
 0x27f   :  { %2560 = vmatprep.subr.bf16.mxu0 %v2559_v56 }
 0x280   :  { %2542 = vmatpush3.bf16.msra.mxu1 %v2541_v21 }
 0x282   :  { %2562 = vmatpush3.bf16.msra.mxu0 %v2561_v62 }
 0x283   :  { %2564 = vmatprep.subr.bf16.mxu0 %v2563_v63 }
 0x286   :  { %2566 = vmatpush3.bf16.msra.mxu0 %v2565_v7 }
 0x287   :  { %2568 = vmatprep.subr.bf16.mxu0 %v2567_v9 }
 0x289   :  { %v1406_v20 = vpop.f32.mrb[8].mxu1 }
 0x28a   :  { %v1407_v22 = vadd.f32 %v1406_v20, %v3572_v40  ;;  %v1408_v23 = vpop.f32.mrb[9].mxu1  ;;  %2570 = vmatpush3.bf16.msra.mxu0 %v2569_v13 }
 0x28b   :  { %v1409_v26 = vadd.f32 %v1408_v23, %v3572_v40  ;;  %v1410_v8 = vpop.f32.mrb[10].mxu1  ;;  %2572 = vmatprep.subr.bf16.mxu0 %v2571_v16 }
 0x28c   :  { %v1411_v27 = vpop.f32.mrb[11].mxu1  ;;  %v1500_v28 = vmax.f32 %v1407_v22, 0.0 }
 0x28d   :  { %v1501_v25 = vmax.f32 %v1409_v26, 0.0 }
 0x28e   :  { %2574 = vmatpush3.bf16.msra.mxu0 %v2573_v24 }
 0x28f   :  { %1945 = vmatprep.mubr.f32.mxu1 %v1501_v25  ;;  %2575 = vmatprep.subr.bf16.mxu0 %v2756_v29 }
 0x290   :  { %1946 = vmatmul.mubr.f32.vlgmr.msra.gmra.mrb[18].mxu1 %v1500_v28 }
 0x294   :  { %v1447_v30 = vpop.f32.mrb[4].mxu0 }
 0x295   :  { %v1448_v42 = vadd.f32 %v1447_v30, %v3572_v40  ;;  %v1449_v31 = vpop.f32.mrb[5].mxu0 }
 0x296   :  { %v1450_v34 = vadd.f32 %v1449_v31, %v3572_v40  ;;  %v1451_v35 = vpop.f32.mrb[6].mxu0 }
 0x297   :  { %v1452_v18 = vpop.f32.mrb[7].mxu0  ;;  %v1502_v38 = vmax.f32 %v1448_v42, 0.0 }
 0x298   :  { %v1503_v36 = vmax.f32 %v1450_v34, 0.0 }
 0x29a   :  { %2015 = vmatprep.mubr.f32.mxu0 %v1503_v36 }
 0x29b   :  { %2016 = vmatmul.mubr.f32.vlgmr.msra.gmra.mrb[12].mxu0 %v1502_v38 }
 0x29c   :  { %2577 = vmatpush3.bf16.msra.mxu0 %v2576_v37  ;;  %2412 = vmatprep.mubr.msk.f32.mxu0 %vm2755_vm3, %v2754_v49 }
 0x29d   :  { %v1488_v15 = vpop.f32.mrb[12].mxu1 }
 0x29e   :  { %v1489_v55 = vadd.f32 %v1488_v15, %v3572_v40  ;;  %v2406_v14 = vpop.f32.mrb[13].mxu1 }
 0x29f   :  { %v1491_v39 = vpop.f32.mrb[14].mxu1 }
 0x2a0   :  { %v1504_v41 = vmax.f32 %v1489_v55, 0.0  ;;  %v2407_v43 = vpop.f32.mrb[15].mxu1 }
 0x2a2   :  { %2413 = vmatmul.mubr.msk.f32.vlgmr.msra.gmra.mrb[14].mxu0 %vm1667_vm11, %v1504_v41 }
 0x2e0   :  { %v2248_v12 = vpop.f32.mrb[8].mxu0 }
 0x2e1   :  { %v2249_v57 = vpop.f32.mrb[9].mxu0 }
 0x2e2   :  { %v2250_v0 = vadd.f32 %v2249_v57, %v2248_v12 }
 0x336   :  { %v2283_v44 = vpop.f32.mrb[16].mxu1 }
 0x337   :  { %v2284_v45 = vpop.f32.mrb[17].mxu1 }
 0x338   :  { %v2285_v46 = vadd.f32 %v2284_v45, %v2283_v44 }
 0x33a   :  { %v1808_v47 = vadd.f32 %v2285_v46, %v2250_v0 }
 0x344   :  { %v2318_v50 = vpop.f32.mrb[10].mxu0 }
 0x345   :  { %v2319_v51 = vpop.f32.mrb[11].mxu0 }
 0x346   :  { %v2320_v52 = vadd.f32 %v2319_v51, %v2318_v50 }
 0x348   :  { %v1878_v53 = vadd.f32 %v2320_v52, %v1808_v47 }
 0x363   :  { %v2353_v49 = vpop.f32.mrb[18].mxu1 }
 0x364   :  { %v2354_v48 = vpop.f32.mrb[19].mxu1 }
 0x365   :  { %v2355_v40 = vadd.f32 %v2354_v48, %v2353_v49 }
 0x367   :  { %v1948_v54 = vadd.f32 %v2355_v40, %v1878_v53 }
 0x36e   :  { %v2388_v56 = vpop.f32.mrb[12].mxu0 }
 0x36f   :  { %v2389_v58 = vpop.f32.mrb[13].mxu0 }
 0x370   :  { %v2390_v59 = vadd.f32 %v2389_v58, %v2388_v56 }
 0x372   :  { %v2018_v60 = vadd.f32 %v2390_v59, %v1948_v54 }
 0x375   :  { %v2087_v61 = vpop.f32.mrb[14].mxu0 }
 0x376   :  { %v2088_v21 = vadd.f32 %v2087_v61, %v2018_v60  ;;  %v2414_v62 = vpop.f32.mrb[15].mxu0 }
 0x378   :  { %2091 = vxpose.xlu1.b32.start.end [1/1] (short) (narrow) %v2088_v21, 8 }
 0x3f8   :  { %v2107_v63 = vpop.trf.xlu1 }
 0x3f9   :  { %2124 = vst.msk [vmem:[#allocation4] sm:$0xf] %vm2123_vm14, %v2107_v63 }
 0x3fa   :  { %2697 = shalt.err (!%p2694_p4)
}
 0x3fb   :  { %s2698_s30 = scalar_lea.hbm %s3885_s4, 64 }
 0x3fc   :  { %p2699_p5 = scmp.ne.s32.totalorder %s3885_s4, %s2698_s30  ;;  %p2702_p6 = scmp.lt.u32.totalorder %s2698_s30, %s3885_s4 }
 0x3fe   :  { %p2704_p7 = pnand %p2702_p6, %p2699_p5 }
 0x400   :  { %2707 = shalt.err (!%p2704_p7)
}
 0x401   :  { %2134 = dma.vmem_to_hbm [thread:$0]  %s2132_s23, 64, %s3885_s4, [#allocation5]  }
 0x402   :  { %2708 = dma.done.wait [#allocation5], 64  }
 0x403   :  { %2709 = vsyncadd [#allocation5], 4294967232 }
 0x404   :  { %2138 = vsyncpa [#allocation5], 1 }

</bundles_post_ra>
